<compile_context>
chip_gen: v6e
topology: v6e:2x2x1
jax: 0.10.0
libtpu: 0.0.40
codegen_flags: <defaults>
</compile_context>

<pallas_src>
from functools import partial

import jax
import jax.numpy as jnp
from jax import lax
from jax.experimental import pallas as pl
from jax.experimental.pallas import tpu as pltpu

EPS = 1e-5  # PyTorch BatchNorm2d default eps


def _rup(v, m=128):
    return (v + m - 1) // m * m


def _halo_rows(W):
    """Rows of halo per side: >= W+1, rounded to 16 (bf16 sublane packing)."""
    return _rup(W + 1, 16)


def _pick_tile(H, W, cap):
    """Largest spatial tile = W * r (whole image rows) with r | H, tile <= cap,
    tile % 8 == 0.  Falls back to the whole image."""
    for r in range(H, 0, -1):
        t = W * r
        if H % r == 0 and t <= cap and t % 8 == 0:
            return t
    return H * W


# ----------------------------- Pallas kernels ------------------------------ #

def _conv3x3_kernel(x_ref, halo_ref, w_ref, b_ref, out_ref, sum_ref, m2_ref,
                    xwin_ref, *, W, tile_hw, hr):
    """3x3 conv (+bias) on one spatial tile via 9 shifted-window MXU matmuls,
    plus per-tile sum / centered-sum-of-squares partials for the BatchNorm.

    x_ref   : (1, tile_hw, Cin)  bf16   flattened rows of this tile
    halo_ref: (1, 1, 2*hr, Cin)  bf16   [hr rows above | hr rows below] (zeros outside image)
    w_ref   : (9, Cin, Cout)     bf16   tap-major conv weights
    b_ref   : (1, Cout)          f32
    out_ref : (1, tile_hw, Cout) bf16   conv + bias (pre-BN)
    sum_ref : (1, 1, 1, Cout)    f32    per-tile sum
    m2_ref  : (1, 1, 1, Cout)    f32    per-tile centered sum of squares
    xwin_ref: (2*hr + tile_hw, Cin) bf16 VMEM scratch (haloed window buffer)
    """
    cout = w_ref.shape[2]

    # Assemble the contiguous haloed buffer (aligned VMEM->VMEM copies).
    xwin_ref[0:hr, :] = halo_ref[0, 0, 0:hr, :]
    xwin_ref[hr:hr + tile_hw, :] = x_ref[0]
    xwin_ref[hr + tile_hw:, :] = halo_ref[0, 0, hr:, :]

    # Column index of every output pixel in this tile (tile starts on a row
    # boundary, so local index mod W is the image column).
    col = lax.broadcasted_iota(jnp.int32, (tile_hw, 1), 0) % W
    not_left = col != 0            # invalid when tap dx == 0 (reads w-1)
    not_right = col != (W - 1)     # invalid when tap dx == 2 (reads w+1)

    acc = jnp.zeros((tile_hw, cout), jnp.float32)
    for tap in range(9):
        dy, dx = divmod(tap, 3)
        start = hr + (dy - 1) * W + (dx - 1)          # static offset
        win = xwin_ref[start:start + tile_hw, :]      # (tile_hw, Cin) bf16
        if dx == 0:
            win = jnp.where(not_left, win, 0.0)
        elif dx == 2:
            win = jnp.where(not_right, win, 0.0)
        acc = acc + jnp.dot(win, w_ref[tap], preferred_element_type=jnp.float32)

    acc = acc + b_ref[...]
    out_ref[0] = acc.astype(out_ref.dtype)

    # Per-tile BN partial statistics (f32, centered -> numerically safe combine).
    s = jnp.sum(acc, axis=0, keepdims=True)           # (1, Cout)
    mean_t = s * (1.0 / tile_hw)
    d = acc - mean_t
    sum_ref[0, 0] = s
    m2_ref[0, 0] = jnp.sum(d * d, axis=0, keepdims=True)


def _bn_relu_kernel(h_ref, scale_ref, shift_ref, o_ref):
    """BN affine + ReLU; bf16 out feeds the next conv's MXU."""
    y = h_ref[0].astype(jnp.float32) * scale_ref[...] + shift_ref[...]
    o_ref[0] = jnp.maximum(y, 0.0).astype(o_ref.dtype)


def _bn_relu_gap_kernel(h_ref, scale_ref, shift_ref, psum_ref):
    """SE squeeze: per-tile partial sum of relu(bn(h)) (reduced in XLA)."""
    y = jnp.maximum(h_ref[0].astype(jnp.float32) * scale_ref[...] + shift_ref[...], 0.0)
    psum_ref[0, 0] = jnp.sum(y, axis=0, keepdims=True)


def _epilogue_proj_kernel(h_ref, gate_ref, x_ref, pw_ref, pb_ref,
                          scale_ref, shift_ref, o_ref):
    """Fused: BN2 + ReLU + SE scale + 1x1 projection (bf16 MXU) + residual."""
    a = jnp.maximum(h_ref[0].astype(jnp.float32) * scale_ref[...] + shift_ref[...], 0.0)
    y = a * gate_ref[0]
    xp = jnp.dot(x_ref[0], pw_ref[...], preferred_element_type=jnp.float32) + pb_ref[...]
    o_ref[0] = xp + y


def _epilogue_id_kernel(h_ref, gate_ref, x_ref, scale_ref, shift_ref, o_ref):
    """Fused: BN2 + ReLU + SE scale + identity residual (f32 residual add)."""
    a = jnp.maximum(h_ref[0].astype(jnp.float32) * scale_ref[...] + shift_ref[...], 0.0)
    o_ref[0] = x_ref[0].astype(jnp.float32) + a * gate_ref[0]


# ------------------------------ pallas_call glue ---------------------------- #

def _conv3x3(x_flat, halo, w, b, W, tile_hw, hr):
    B, HW, Cin = x_flat.shape
    T = HW // tile_hw
    Cout = w.shape[2]
    kernel = partial(_conv3x3_kernel, W=W, tile_hw=tile_hw, hr=hr)
    return pl.pallas_call(
        kernel,
        grid=(B, T),
        out_shape=(jax.ShapeDtypeStruct((B, HW, Cout), jnp.bfloat16),
                   jax.ShapeDtypeStruct((B, T, 1, Cout), jnp.float32),
                   jax.ShapeDtypeStruct((B, T, 1, Cout), jnp.float32)),
        in_specs=[pl.BlockSpec((1, tile_hw, Cin), lambda bi, ti: (bi, ti, 0)),
                  pl.BlockSpec((1, 1, 2 * hr, Cin), lambda bi, ti: (bi, ti, 0, 0)),
                  # Constant-index weight block (re-used across the whole grid).
                  pl.BlockSpec((9, Cin, Cout), lambda bi, ti: (0, 0, 0)),
                  pl.BlockSpec((1, Cout), lambda bi, ti: (0, 0))],
        out_specs=(pl.BlockSpec((1, tile_hw, Cout), lambda bi, ti: (bi, ti, 0)),
                   pl.BlockSpec((1, 1, 1, Cout), lambda bi, ti: (bi, ti, 0, 0)),
                   pl.BlockSpec((1, 1, 1, Cout), lambda bi, ti: (bi, ti, 0, 0))),
        scratch_shapes=[pltpu.VMEM((2 * hr + tile_hw, Cin), jnp.bfloat16)],
        compiler_params=pltpu.CompilerParams(
            dimension_semantics=("parallel", "parallel"),
            vmem_limit_bytes=32 * 1024 * 1024),
    )(x_flat, halo, w, b)


def _bn_relu(h_raw, scale, shift, tile_hw):
    B, HW, C = h_raw.shape
    T = HW // tile_hw
    return pl.pallas_call(
        _bn_relu_kernel,
        grid=(B, T),
        out_shape=jax.ShapeDtypeStruct((B, HW, C), jnp.bfloat16),
        in_specs=[pl.BlockSpec((1, tile_hw, C), lambda bi, ti: (bi, ti, 0)),
                  pl.BlockSpec((1, C), lambda bi, ti: (0, 0)),
                  pl.BlockSpec((1, C), lambda bi, ti: (0, 0))],
        out_specs=pl.BlockSpec((1, tile_hw, C), lambda bi, ti: (bi, ti, 0)),
        compiler_params=pltpu.CompilerParams(
            dimension_semantics=("parallel", "parallel")),
    )(h_raw, scale, shift)


def _bn_relu_gap(h_raw, scale, shift, tile_hw):
    B, HW, C = h_raw.shape
    T = HW // tile_hw
    return pl.pallas_call(
        _bn_relu_gap_kernel,
        grid=(B, T),
        out_shape=jax.ShapeDtypeStruct((B, T, 1, C), jnp.float32),
        in_specs=[pl.BlockSpec((1, tile_hw, C), lambda bi, ti: (bi, ti, 0)),
                  pl.BlockSpec((1, C), lambda bi, ti: (0, 0)),
                  pl.BlockSpec((1, C), lambda bi, ti: (0, 0))],
        out_specs=pl.BlockSpec((1, 1, 1, C), lambda bi, ti: (bi, ti, 0, 0)),
        compiler_params=pltpu.CompilerParams(
            dimension_semantics=("parallel", "parallel")),
    )(h_raw, scale, shift)


def _epilogue(h_raw, gate, x_res, scale, shift, pw, pb, tile_hw):
    B, HW, C = h_raw.shape
    Cin = x_res.shape[2]
    T = HW // tile_hw
    hspec = pl.BlockSpec((1, tile_hw, C), lambda bi, ti: (bi, ti, 0))
    gspec = pl.BlockSpec((1, 1, C), lambda bi, ti: (bi, 0, 0))
    xspec = pl.BlockSpec((1, tile_hw, Cin), lambda bi, ti: (bi, ti, 0))
    vspec = pl.BlockSpec((1, C), lambda bi, ti: (0, 0))
    if pw is not None:
        kernel = _epilogue_proj_kernel
        in_specs = [hspec, gspec, xspec,
                    pl.BlockSpec((Cin, C), lambda bi, ti: (0, 0)), vspec,
                    vspec, vspec]
        args = (h_raw, gate, x_res, pw, pb, scale, shift)
    else:
        kernel = _epilogue_id_kernel
        in_specs = [hspec, gspec, xspec, vspec, vspec]
        args = (h_raw, gate, x_res, scale, shift)
    return pl.pallas_call(
        kernel,
        grid=(B, T),
        out_shape=jax.ShapeDtypeStruct((B, HW, C), jnp.float32),
        in_specs=in_specs,
        out_specs=hspec,
        compiler_params=pltpu.CompilerParams(
            dimension_semantics=("parallel", "parallel")),
    )(*args)


# ------------------------------ XLA-side glue -------------------------------- #

def _make_halo(flat, tile_hw, hr):
    """Gather the hr rows before/after each spatial tile (zeros outside the
    image): (B, HW, C) -> (B, T, 2*hr, C).  Only ~2*hr rows per tile of extra
    HBM traffic (no full-image padding/concat pass)."""
    B, HW, C = flat.shape
    T = HW // tile_hw
    starts = jnp.arange(T) * tile_hw
    r = jnp.arange(hr)
    above = starts[:, None] - hr + r[None, :]          # (T, hr)
    below = starts[:, None] + tile_hw + r[None, :]     # (T, hr)
    pos = jnp.concatenate([above, below], axis=1)      # (T, 2*hr)
    valid = (pos >= 0) & (pos < HW)
    g = flat[:, jnp.clip(pos, 0, HW - 1), :]           # (B, T, 2*hr, C)
    return jnp.where(valid[None, :, :, None], g, jnp.zeros((), flat.dtype))


def _bn_affine_from_tiles(sums, m2s, gamma, beta, tile_hw, n_total):
    """Combine per-tile (sum, centered M2) partials (Chan's formula) and fold
    the batch statistics into a per-channel scale/shift (f32)."""
    C = sums.shape[-1]
    s = sums.reshape(-1, C)                            # (B*T, C)
    m2 = m2s.reshape(-1, C)
    mean = jnp.sum(s, axis=0) / n_total
    mean_t = s / tile_hw
    var = (jnp.sum(m2, axis=0)
           + tile_hw * jnp.sum((mean_t - mean) ** 2, axis=0)) / n_total
    scale = gamma.reshape(-1) * lax.rsqrt(var + EPS)
    shift = beta.reshape(-1) - mean * scale
    return scale.reshape(1, C), shift.reshape(1, C)


# ------------------------------- parameters --------------------------------- #

def init_params(key, in_channel, out_channel, reduction_rate):
    mid = in_channel // reduction_rate
    se_mid = out_channel // reduction_rate
    cinp, midp = _rup(in_channel), _rup(mid)
    coutp, semidp = _rup(out_channel), _rup(se_mid)
    ks = jax.random.split(key, 14)

    def conv_w(k, cin, cout, cinp_, coutp_):
        w = jax.random.normal(k, (3, 3, cin, cout), jnp.float32) * 0.1
        wp = jnp.zeros((9, cinp_, coutp_), jnp.float32)
        wp = wp.at[:, :cin, :cout].set(w.reshape(9, cin, cout))
        return wp.astype(jnp.bfloat16)        # MXU operands in bf16

    def vec(k, c, cp):
        v = jax.random.normal(k, (1, c), jnp.float32) * 0.1
        return jnp.zeros((1, cp), jnp.float32).at[:, :c].set(v)

    p = {
        "w1": conv_w(ks[0], in_channel, mid, cinp, midp),
        "b1": vec(ks[1], mid, midp),
        "bn1_g": jnp.zeros((1, midp), jnp.float32).at[:, :mid].set(
            1.0 + jax.random.normal(ks[2], (1, mid), jnp.float32) * 0.1),
        "bn1_b": vec(ks[3], mid, midp),
        "w2": conv_w(ks[4], mid, out_channel, midp, coutp),
        "b2": vec(ks[5], out_channel, coutp),
        "bn2_g": jnp.zeros((1, coutp), jnp.float32).at[:, :out_channel].set(
            1.0 + jax.random.normal(ks[6], (1, out_channel), jnp.float32) * 0.1),
        "bn2_b": vec(ks[7], out_channel, coutp),
        # SE linears stored pre-transposed as (in, out), f32 (tiny, stays in XLA)
        "lw1": jnp.zeros((coutp, semidp), jnp.float32).at[:out_channel, :se_mid].set(
            jax.random.normal(ks[8], (out_channel, se_mid), jnp.float32) * 0.1),
        "lb1": vec(ks[9], se_mid, semidp),
        "lw2": jnp.zeros((semidp, coutp), jnp.float32).at[:se_mid, :out_channel].set(
            jax.random.normal(ks[10], (se_mid, out_channel), jnp.float32) * 0.1),
        "lb2": vec(ks[11], out_channel, coutp),
    }
    if in_channel != out_channel:
        pw = jnp.zeros((cinp, coutp), jnp.float32).at[:in_channel, :out_channel].set(
            jax.random.normal(ks[12], (in_channel, out_channel), jnp.float32) * 0.1)
        p["pw"] = pw.astype(jnp.bfloat16)      # bf16 MXU projection weights
        p["pb"] = vec(ks[13], out_channel, coutp)
    return p


# --------------------------------- forward ---------------------------------- #

@partial(jax.jit, static_argnums=(2, 3))
def basic_conv_block(x_nchw, params, out_channel, tile_cap=1024):
    B, Cin, H, W = x_nchw.shape
    HW = H * W
    cinp = params["w1"].shape[1]
    coutp = params["w2"].shape[2]
    tile_hw = _pick_tile(H, W, tile_cap)
    hr = _halo_rows(W)

    x = jnp.transpose(x_nchw, (0, 2, 3, 1)).astype(jnp.float32)       # NHWC
    x = jnp.pad(x, ((0, 0), (0, 0), (0, 0), (0, cinp - Cin)))         # lane-pad channels
    x_flat_f32 = x.reshape(B, HW, cinp)
    x_flat_bf = x_flat_f32.astype(jnp.bfloat16)

    # ---- conv_1 + bias (per-tile BN partial stats) ----
    halo1 = _make_halo(x_flat_bf, tile_hw, hr)
    h1_raw, s1, m21 = _conv3x3(x_flat_bf, halo1, params["w1"], params["b1"],
                               W, tile_hw, hr)
    scale1, shift1 = _bn_affine_from_tiles(s1, m21, params["bn1_g"], params["bn1_b"],
                                           tile_hw, B * HW)

    # ---- batchnorm_1 + relu (tiled), bf16 out feeds conv_2's MXU ----
    h1 = _bn_relu(h1_raw, scale1, shift1, tile_hw)

    # ---- conv_2 + bias (per-tile BN partial stats) ----
    halo2 = _make_halo(h1, tile_hw, hr)
    h2_raw, s2, m22 = _conv3x3(h1, halo2, params["w2"], params["b2"],
                               W, tile_hw, hr)
    scale2, shift2 = _bn_affine_from_tiles(s2, m22, params["bn2_g"], params["bn2_b"],
                                           tile_hw, B * HW)

    # ---- SE squeeze: GAP of relu(bn2(conv2)) as per-tile partial sums ----
    gap_p = _bn_relu_gap(h2_raw, scale2, shift2, tile_hw)             # (B, T, 1, C)
    gap = jnp.sum(gap_p[:, :, 0, :], axis=1) * (1.0 / HW)             # (B, C)
    # TODO(synk): SE excitation MLP is O(B*C) — left to XLA rather than a pallas_call.
    z = jnp.maximum(gap @ params["lw1"] + params["lb1"], 0.0)
    gate = jax.nn.sigmoid(z @ params["lw2"] + params["lb2"])
    gate = gate[:, None, :]                                           # (B, 1, C)

    # ---- fused epilogue: bn2 + relu + SE scaling + projection/residual ----
    if "pw" in params:
        out_flat = _epilogue(h2_raw, gate, x_flat_bf, scale2, shift2,
                             params["pw"], params["pb"], tile_hw)
    else:
        out_flat = _epilogue(h2_raw, gate, x_flat_f32, scale2, shift2,
                             None, None, tile_hw)

    out = out_flat.reshape(B, H, W, coutp)[..., :out_channel]
    return jnp.transpose(out, (0, 3, 1, 2))                           # back to NCHW


# ----------------------------- pure-JAX reference --------------------------- #

def reference(x_nchw, params, out_channel):
    """Mirrors the kernel's precision choices (bf16 MXU operands, bf16 conv
    outputs, f32 stats/affine) so the comparison isolates real bugs."""
    B, Cin, H, W = x_nchw.shape
    cinp = params["w1"].shape[1]
    x = jnp.transpose(x_nchw, (0, 2, 3, 1)).astype(jnp.float32)
    x = jnp.pad(x, ((0, 0), (0, 0), (0, 0), (0, cinp - Cin)))

    def bf(a):
        return a.astype(jnp.bfloat16).astype(jnp.float32)

    def conv3(xin, w9, b):
        ci, co = w9.shape[1], w9.shape[2]
        w = w9.astype(jnp.float32).reshape(3, 3, ci, co)
        y = lax.conv_general_dilated(
            bf(xin), w, (1, 1), "SAME",
            dimension_numbers=("NHWC", "HWIO", "NHWC"),
            precision=lax.Precision.HIGHEST)
        return y + b.reshape(1, 1, 1, -1)

    def bn_affine(y, g, be):
        mean = jnp.mean(y, axis=(0, 1, 2))
        var = jnp.mean((y - mean) ** 2, axis=(0, 1, 2))
        scale = g.reshape(-1) * lax.rsqrt(var + EPS)
        shift = be.reshape(-1) - mean * scale
        return scale, shift

    h1_f = conv3(x, params["w1"], params["b1"])
    sc1, sh1 = bn_affine(h1_f, params["bn1_g"], params["bn1_b"])
    a1 = jnp.maximum(bf(h1_f) * sc1 + sh1, 0.0)            # bf16-stored conv out

    h2_f = conv3(a1, params["w2"], params["b2"])
    sc2, sh2 = bn_affine(h2_f, params["bn2_g"], params["bn2_b"])
    a2 = jnp.maximum(bf(h2_f) * sc2 + sh2, 0.0)

    gap = jnp.mean(a2, axis=(1, 2))
    z = jnp.maximum(gap @ params["lw1"] + params["lb1"], 0.0)
    gate = jax.nn.sigmoid(z @ params["lw2"] + params["lb2"])
    out = a2 * gate[:, None, None, :]

    if "pw" in params:
        xp = jnp.einsum("bhwc,co->bhwo", bf(x), params["pw"].astype(jnp.float32),
                        precision=lax.Precision.HIGHEST) + params["pb"].reshape(1, 1, 1, -1)
    else:
        xp = x
    res = xp + out
    return jnp.transpose(res[..., :out_channel], (0, 3, 1, 2))


# ----------------------------------- main ------------------------------------ #

if __name__ == "__main__":
    B, Cin, Cout, H, W = 2, 4, 8, 16, 16
    reduction_rate = 1  # see NOTE at top: module only shape-consistent for rr == 1

    key = jax.random.PRNGKey(0)
    kx, kp = jax.random.split(key)
    x = jax.random.normal(kx, (B, Cin, H, W), jnp.float32)
    params = init_params(kp, Cin, Cout, reduction_rate)

    # Small tile cap so the spatial tiling / halo path is actually exercised
    # (tile_hw = 64 -> 4 spatial tiles per image).
    out = basic_conv_block(x, params, Cout, 64)
    out = jax.block_until_ready(out)
    assert out.shape == (B, Cout, H, W)

    ref = reference(x, params, Cout)
    max_err = float(jnp.max(jnp.abs(out - ref)))
    assert jnp.allclose(out, ref, atol=5e-3, rtol=5e-3), f"max abs err {max_err}"

    print("KERNEL_OK")
</pallas_src>

<mosaic_0001>
module attributes {stable_mosaic.version = 11 : i64} {
  func.func @_bn_relu_kernel(%arg0: i32, %arg1: i32, %arg2: memref<1x64x128xbf16, #tpu.memory_space<vmem>>, %arg3: memref<1x128xf32, #tpu.memory_space<vmem>>, %arg4: memref<1x128xf32, #tpu.memory_space<vmem>>, %arg5: memref<1x64x128xbf16, #tpu.memory_space<vmem>>) attributes {dimension_semantics = [#tpu.dimension_semantics<parallel>, #tpu.dimension_semantics<parallel>], iteration_bounds = array<i64: 2, 4>, scalar_prefetch = 0 : i64, scratch_operands = 0 : i64, tpu.core_type = #tpu.core_type<tc>, window_params = [{transform_indices = @transform_0, window_bounds = array<i64: 1, 64, 128>}, {pipeline_mode = #tpu.pipeline_mode<synchronous>, transform_indices = @transform_1, window_bounds = array<i64: 1, 128>}, {pipeline_mode = #tpu.pipeline_mode<synchronous>, transform_indices = @transform_2, window_bounds = array<i64: 1, 128>}, {transform_indices = @transform_3, window_bounds = array<i64: 1, 64, 128>}]} {
    %c0 = arith.constant 0 : index
    %c0_0 = arith.constant 0 : index
    %c0_1 = arith.constant 0 : index
    %0 = vector.load %arg2[%c0, %c0_0, %c0_1] : memref<1x64x128xbf16, #tpu.memory_space<vmem>>, vector<1x64x128xbf16>
    %1 = vector.shape_cast %0 : vector<1x64x128xbf16> to vector<64x128xbf16>
    %2 = arith.extf %1 : vector<64x128xbf16> to vector<64x128xf32>
    %c0_2 = arith.constant 0 : index
    %c0_3 = arith.constant 0 : index
    %3 = vector.load %arg3[%c0_2, %c0_3] : memref<1x128xf32, #tpu.memory_space<vmem>>, vector<1x128xf32>
    %4 = vector.broadcast %3 : vector<1x128xf32> to vector<64x128xf32>
    %5 = arith.mulf %2, %4 : vector<64x128xf32>
    %c0_4 = arith.constant 0 : index
    %c0_5 = arith.constant 0 : index
    %6 = vector.load %arg4[%c0_4, %c0_5] : memref<1x128xf32, #tpu.memory_space<vmem>>, vector<1x128xf32>
    %7 = vector.broadcast %6 : vector<1x128xf32> to vector<64x128xf32>
    %8 = arith.addf %5, %7 : vector<64x128xf32>
    %cst = arith.constant 0.000000e+00 : f32
    %9 = vector.broadcast %cst : f32 to vector<64x128xf32>
    %10 = arith.maximumf %8, %9 : vector<64x128xf32>
    %11 = arith.truncf %10 : vector<64x128xf32> to vector<64x128xbf16>
    %c0_6 = arith.constant 0 : index
    %c0_7 = arith.constant 0 : index
    %c0_8 = arith.constant 0 : index
    %12 = vector.load %arg5[%c0_6, %c0_7, %c0_8] : memref<1x64x128xbf16, #tpu.memory_space<vmem>>, vector<1x64x128xbf16>
    %13 = vector.shape_cast %12 : vector<1x64x128xbf16> to vector<64x128xbf16>
    %14 = vector.shape_cast %11 : vector<64x128xbf16> to vector<1x64x128xbf16>
    tpu.vector_store %arg5[%c0_6, %c0_7, %c0_8], %14 {strides = array<i32>} : memref<1x64x128xbf16, #tpu.memory_space<vmem>>, vector<1x64x128xbf16>,
    return
  }
  func.func @transform_0(%arg0: i32, %arg1: i32) -> (i32, i32, i32) {
    %c0_i32 = arith.constant 0 : i32
    %c0_i32_0 = arith.constant 0 : i32
    return %arg0, %arg1, %c0_i32 : i32, i32, i32
  }
  func.func @transform_1(%arg0: i32, %arg1: i32) -> (i32, i32) {
    %c0_i32 = arith.constant 0 : i32
    %c0_i32_0 = arith.constant 0 : i32
    %c0_i32_1 = arith.constant 0 : i32
    return %c0_i32, %c0_i32_0 : i32, i32
  }
  func.func @transform_2(%arg0: i32, %arg1: i32) -> (i32, i32) {
    %c0_i32 = arith.constant 0 : i32
    %c0_i32_0 = arith.constant 0 : i32
    %c0_i32_1 = arith.constant 0 : i32
    return %c0_i32, %c0_i32_0 : i32, i32
  }
  func.func @transform_3(%arg0: i32, %arg1: i32) -> (i32, i32, i32) {
    %c0_i32 = arith.constant 0 : i32
    %c0_i32_0 = arith.constant 0 : i32
    return %arg0, %arg1, %c0_i32 : i32, i32, i32
  }
}

module attributes {stable_mosaic.version = 11 : i64} {
  func.func @_conv3x3_kernel(%arg0: i32, %arg1: i32, %arg2: memref<1x64x128xbf16, #tpu.memory_space<vmem>>, %arg3: memref<1x1x64x128xbf16, #tpu.memory_space<vmem>>, %arg4: memref<9x128x128xbf16, #tpu.memory_space<vmem>>, %arg5: memref<1x128xf32, #tpu.memory_space<vmem>>, %arg6: memref<1x64x128xbf16, #tpu.memory_space<vmem>>, %arg7: memref<1x1x1x128xf32, #tpu.memory_space<vmem>>, %arg8: memref<1x1x1x128xf32, #tpu.memory_space<vmem>>, %arg9: memref<128x128xbf16, #tpu.memory_space<vmem>>) attributes {dimension_semantics = [#tpu.dimension_semantics<parallel>, #tpu.dimension_semantics<parallel>], iteration_bounds = array<i64: 2, 4>, scalar_prefetch = 0 : i64, scratch_operands = 1 : i64, tpu.core_type = #tpu.core_type<tc>, window_params = [{transform_indices = @transform_0, window_bounds = array<i64: 1, 64, 128>}, {transform_indices = @transform_1, window_bounds = array<i64: 1, 1, 64, 128>}, {pipeline_mode = #tpu.pipeline_mode<synchronous>, transform_indices = @transform_2, window_bounds = array<i64: 9, 128, 128>}, {pipeline_mode = #tpu.pipeline_mode<synchronous>, transform_indices = @transform_3, window_bounds = array<i64: 1, 128>}, {transform_indices = @transform_4, window_bounds = array<i64: 1, 64, 128>}, {transform_indices = @transform_5, window_bounds = array<i64: 1, 1, 1, 128>}, {transform_indices = @transform_6, window_bounds = array<i64: 1, 1, 1, 128>}]} {
    %c0 = arith.constant 0 : index
    %c0_0 = arith.constant 0 : index
    %c0_1 = arith.constant 0 : index
    %c0_2 = arith.constant 0 : index
    %0 = vector.load %arg3[%c0, %c0_0, %c0_1, %c0_2] : memref<1x1x64x128xbf16, #tpu.memory_space<vmem>>, vector<1x1x32x128xbf16>
    %1 = vector.shape_cast %0 : vector<1x1x32x128xbf16> to vector<32x128xbf16>
    %c0_3 = arith.constant 0 : index
    %c0_4 = arith.constant 0 : index
    %2 = vector.load %arg9[%c0_3, %c0_4] : memref<128x128xbf16, #tpu.memory_space<vmem>>, vector<32x128xbf16>
    tpu.vector_store %arg9[%c0_3, %c0_4], %1 {strides = array<i32>} : memref<128x128xbf16, #tpu.memory_space<vmem>>, vector<32x128xbf16>,
    %c0_5 = arith.constant 0 : index
    %c0_6 = arith.constant 0 : index
    %c0_7 = arith.constant 0 : index
    %3 = vector.load %arg2[%c0_5, %c0_6, %c0_7] : memref<1x64x128xbf16, #tpu.memory_space<vmem>>, vector<1x64x128xbf16>
    %4 = vector.shape_cast %3 : vector<1x64x128xbf16> to vector<64x128xbf16>
    %c32 = arith.constant 32 : index
    %c0_8 = arith.constant 0 : index
    %5 = vector.load %arg9[%c32, %c0_8] : memref<128x128xbf16, #tpu.memory_space<vmem>>, vector<64x128xbf16>
    tpu.vector_store %arg9[%c32, %c0_8], %4 {strides = array<i32>} : memref<128x128xbf16, #tpu.memory_space<vmem>>, vector<64x128xbf16>,
    %c0_9 = arith.constant 0 : index
    %c0_10 = arith.constant 0 : index
    %c32_11 = arith.constant 32 : index
    %c0_12 = arith.constant 0 : index
    %6 = vector.load %arg3[%c0_9, %c0_10, %c32_11, %c0_12] : memref<1x1x64x128xbf16, #tpu.memory_space<vmem>>, vector<1x1x32x128xbf16>
    %7 = vector.shape_cast %6 : vector<1x1x32x128xbf16> to vector<32x128xbf16>
    %c96 = arith.constant 96 : index
    %c0_13 = arith.constant 0 : index
    %8 = vector.load %arg9[%c96, %c0_13] : memref<128x128xbf16, #tpu.memory_space<vmem>>, vector<32x128xbf16>
    tpu.vector_store %arg9[%c96, %c0_13], %7 {strides = array<i32>} : memref<128x128xbf16, #tpu.memory_space<vmem>>, vector<32x128xbf16>,
    %9 = tpu.iota {dimensions = array<i32: 0>} : vector<64x1xi32>
    %c16_i32 = arith.constant 16 : i32
    %c0_i32 = arith.constant 0 : i32
    %10 = arith.cmpi eq, %c16_i32, %c0_i32 : i32
    %c1_i32 = arith.constant 1 : i32
    %11 = arith.select %10, %c1_i32, %c16_i32 : i32
    %12 = vector.broadcast %11 : i32 to vector<64x1xi32>
    %13 = arith.remsi %9, %12 : vector<64x1xi32>
    %c0_i32_14 = arith.constant 0 : i32
    %14 = vector.broadcast %c0_i32_14 : i32 to vector<64x1xi32>
    %15 = arith.cmpi ne, %13, %14 : vector<64x1xi32>
    %c0_i32_15 = arith.constant 0 : i32
    %16 = vector.broadcast %c0_i32_15 : i32 to vector<64x1xi32>
    %17 = arith.cmpi slt, %13, %16 : vector<64x1xi32>
    %c0_i32_16 = arith.constant 0 : i32
    %18 = arith.cmpi slt, %11, %c0_i32_16 : i32
    %19 = vector.broadcast %18 : i1 to vector<64x1xi1>
    %20 = vector.broadcast %19 : vector<64x1xi1> to vector<64x1xi1>
    %21 = arith.xori %17, %20 : vector<64x1xi1>
    %22 = arith.andi %21, %15 : vector<64x1xi1>
    %23 = vector.broadcast %11 : i32 to vector<64x1xi32>
    %24 = arith.addi %13, %23 : vector<64x1xi32>
    %25 = arith.select %22, %24, %13 : vector<64x1xi1>, vector<64x1xi32>
    %c0_i32_17 = arith.constant 0 : i32
    %26 = vector.broadcast %c0_i32_17 : i32 to vector<64x1xi32>
    %27 = arith.cmpi ne, %25, %26 : vector<64x1xi32>
    %c15_i32 = arith.constant 15 : i32
    %28 = vector.broadcast %c15_i32 : i32 to vector<64x1xi32>
    %29 = arith.cmpi ne, %25, %28 : vector<64x1xi32>
    %cst = arith.constant 0.000000e+00 : f32
    %30 = vector.broadcast %cst : f32 to vector<64x128xf32>
    %c15 = arith.constant 15 : index
    %c0_18 = arith.constant 0 : index
    %31 = vector.load %arg9[%c15, %c0_18] : memref<128x128xbf16, #tpu.memory_space<vmem>>, vector<64x128xbf16>
    %cst_19 = arith.constant 0.000000e+00 : f32
    %32 = arith.truncf %cst_19 : f32 to bf16
    %33 = vector.shape_cast %27 : vector<64x1xi1> to vector<64x1xi1>
    %34 = vector.broadcast %33 : vector<64x1xi1> to vector<64x128xi1>
    %35 = vector.broadcast %32 : bf16 to vector<64x128xbf16>
    %36 = arith.select %34, %31, %35 : vector<64x128xi1>, vector<64x128xbf16>
    %c0_20 = arith.constant 0 : index
    %c0_21 = arith.constant 0 : index
    %c0_22 = arith.constant 0 : index
    %37 = vector.load %arg4[%c0_20, %c0_21, %c0_22] : memref<9x128x128xbf16, #tpu.memory_space<vmem>>, vector<1x128x128xbf16>
    %38 = vector.shape_cast %37 : vector<1x128x128xbf16> to vector<128x128xbf16>
    %cst_23 = arith.constant dense<0.000000e+00> : vector<64x128xf32>
    %39 = tpu.matmul %36, %38, %cst_23 {dimension_numbers = #tpu.dot_dimension_numbers<[1], [0], [0], [1], [0, 0, 1, 1], [], []>} : vector<64x128xbf16>, vector<128x128xbf16>, vector<64x128xf32> -> vector<64x128xf32>
    %40 = arith.addf %30, %39 : vector<64x128xf32>
    %c16 = arith.constant 16 : index
    %c0_24 = arith.constant 0 : index
    %41 = vector.load %arg9[%c16, %c0_24] : memref<128x128xbf16, #tpu.memory_space<vmem>>, vector<64x128xbf16>
    %c1 = arith.constant 1 : index
    %c0_25 = arith.constant 0 : index
    %c0_26 = arith.constant 0 : index
    %42 = vector.load %arg4[%c1, %c0_25, %c0_26] : memref<9x128x128xbf16, #tpu.memory_space<vmem>>, vector<1x128x128xbf16>
    %43 = vector.shape_cast %42 : vector<1x128x128xbf16> to vector<128x128xbf16>
    %cst_27 = arith.constant dense<0.000000e+00> : vector<64x128xf32>
    %44 = tpu.matmul %41, %43, %cst_27 {dimension_numbers = #tpu.dot_dimension_numbers<[1], [0], [0], [1], [0, 0, 1, 1], [], []>} : vector<64x128xbf16>, vector<128x128xbf16>, vector<64x128xf32> -> vector<64x128xf32>
    %45 = arith.addf %40, %44 : vector<64x128xf32>
    %c17 = arith.constant 17 : index
    %c0_28 = arith.constant 0 : index
    %46 = vector.load %arg9[%c17, %c0_28] : memref<128x128xbf16, #tpu.memory_space<vmem>>, vector<64x128xbf16>
    %cst_29 = arith.constant 0.000000e+00 : f32
    %47 = arith.truncf %cst_29 : f32 to bf16
    %48 = vector.shape_cast %29 : vector<64x1xi1> to vector<64x1xi1>
    %49 = vector.broadcast %48 : vector<64x1xi1> to vector<64x128xi1>
    %50 = vector.broadcast %47 : bf16 to vector<64x128xbf16>
    %51 = arith.select %49, %46, %50 : vector<64x128xi1>, vector<64x128xbf16>
    %c2 = arith.constant 2 : index
    %c0_30 = arith.constant 0 : index
    %c0_31 = arith.constant 0 : index
    %52 = vector.load %arg4[%c2, %c0_30, %c0_31] : memref<9x128x128xbf16, #tpu.memory_space<vmem>>, vector<1x128x128xbf16>
    %53 = vector.shape_cast %52 : vector<1x128x128xbf16> to vector<128x128xbf16>
    %cst_32 = arith.constant dense<0.000000e+00> : vector<64x128xf32>
    %54 = tpu.matmul %51, %53, %cst_32 {dimension_numbers = #tpu.dot_dimension_numbers<[1], [0], [0], [1], [0, 0, 1, 1], [], []>} : vector<64x128xbf16>, vector<128x128xbf16>, vector<64x128xf32> -> vector<64x128xf32>
    %55 = arith.addf %45, %54 : vector<64x128xf32>
    %c31 = arith.constant 31 : index
    %c0_33 = arith.constant 0 : index
    %56 = vector.load %arg9[%c31, %c0_33] : memref<128x128xbf16, #tpu.memory_space<vmem>>, vector<64x128xbf16>
    %cst_34 = arith.constant 0.000000e+00 : f32
    %57 = arith.truncf %cst_34 : f32 to bf16
    %58 = vector.shape_cast %27 : vector<64x1xi1> to vector<64x1xi1>
    %59 = vector.broadcast %58 : vector<64x1xi1> to vector<64x128xi1>
    %60 = vector.broadcast %57 : bf16 to vector<64x128xbf16>
    %61 = arith.select %59, %56, %60 : vector<64x128xi1>, vector<64x128xbf16>
    %c3 = arith.constant 3 : index
    %c0_35 = arith.constant 0 : index
    %c0_36 = arith.constant 0 : index
    %62 = vector.load %arg4[%c3, %c0_35, %c0_36] : memref<9x128x128xbf16, #tpu.memory_space<vmem>>, vector<1x128x128xbf16>
    %63 = vector.shape_cast %62 : vector<1x128x128xbf16> to vector<128x128xbf16>
    %cst_37 = arith.constant dense<0.000000e+00> : vector<64x128xf32>
    %64 = tpu.matmul %61, %63, %cst_37 {dimension_numbers = #tpu.dot_dimension_numbers<[1], [0], [0], [1], [0, 0, 1, 1], [], []>} : vector<64x128xbf16>, vector<128x128xbf16>, vector<64x128xf32> -> vector<64x128xf32>
    %65 = arith.addf %55, %64 : vector<64x128xf32>
    %c32_38 = arith.constant 32 : index
    %c0_39 = arith.constant 0 : index
    %66 = vector.load %arg9[%c32_38, %c0_39] : memref<128x128xbf16, #tpu.memory_space<vmem>>, vector<64x128xbf16>
    %c4 = arith.constant 4 : index
    %c0_40 = arith.constant 0 : index
    %c0_41 = arith.constant 0 : index
    %67 = vector.load %arg4[%c4, %c0_40, %c0_41] : memref<9x128x128xbf16, #tpu.memory_space<vmem>>, vector<1x128x128xbf16>
    %68 = vector.shape_cast %67 : vector<1x128x128xbf16> to vector<128x128xbf16>
    %cst_42 = arith.constant dense<0.000000e+00> : vector<64x128xf32>
    %69 = tpu.matmul %66, %68, %cst_42 {dimension_numbers = #tpu.dot_dimension_numbers<[1], [0], [0], [1], [0, 0, 1, 1], [], []>} : vector<64x128xbf16>, vector<128x128xbf16>, vector<64x128xf32> -> vector<64x128xf32>
    %70 = arith.addf %65, %69 : vector<64x128xf32>
    %c33 = arith.constant 33 : index
    %c0_43 = arith.constant 0 : index
    %71 = vector.load %arg9[%c33, %c0_43] : memref<128x128xbf16, #tpu.memory_space<vmem>>, vector<64x128xbf16>
    %cst_44 = arith.constant 0.000000e+00 : f32
    %72 = arith.truncf %cst_44 : f32 to bf16
    %73 = vector.shape_cast %29 : vector<64x1xi1> to vector<64x1xi1>
    %74 = vector.broadcast %73 : vector<64x1xi1> to vector<64x128xi1>
    %75 = vector.broadcast %72 : bf16 to vector<64x128xbf16>
    %76 = arith.select %74, %71, %75 : vector<64x128xi1>, vector<64x128xbf16>
    %c5 = arith.constant 5 : index
    %c0_45 = arith.constant 0 : index
    %c0_46 = arith.constant 0 : index
    %77 = vector.load %arg4[%c5, %c0_45, %c0_46] : memref<9x128x128xbf16, #tpu.memory_space<vmem>>, vector<1x128x128xbf16>
    %78 = vector.shape_cast %77 : vector<1x128x128xbf16> to vector<128x128xbf16>
    %cst_47 = arith.constant dense<0.000000e+00> : vector<64x128xf32>
    %79 = tpu.matmul %76, %78, %cst_47 {dimension_numbers = #tpu.dot_dimension_numbers<[1], [0], [0], [1], [0, 0, 1, 1], [], []>} : vector<64x128xbf16>, vector<128x128xbf16>, vector<64x128xf32> -> vector<64x128xf32>
    %80 = arith.addf %70, %79 : vector<64x128xf32>
    %c47 = arith.constant 47 : index
    %c0_48 = arith.constant 0 : index
    %81 = vector.load %arg9[%c47, %c0_48] : memref<128x128xbf16, #tpu.memory_space<vmem>>, vector<64x128xbf16>
    %cst_49 = arith.constant 0.000000e+00 : f32
    %82 = arith.truncf %cst_49 : f32 to bf16
    %83 = vector.shape_cast %27 : vector<64x1xi1> to vector<64x1xi1>
    %84 = vector.broadcast %83 : vector<64x1xi1> to vector<64x128xi1>
    %85 = vector.broadcast %82 : bf16 to vector<64x128xbf16>
    %86 = arith.select %84, %81, %85 : vector<64x128xi1>, vector<64x128xbf16>
    %c6 = arith.constant 6 : index
    %c0_50 = arith.constant 0 : index
    %c0_51 = arith.constant 0 : index
    %87 = vector.load %arg4[%c6, %c0_50, %c0_51] : memref<9x128x128xbf16, #tpu.memory_space<vmem>>, vector<1x128x128xbf16>
    %88 = vector.shape_cast %87 : vector<1x128x128xbf16> to vector<128x128xbf16>
    %cst_52 = arith.constant dense<0.000000e+00> : vector<64x128xf32>
    %89 = tpu.matmul %86, %88, %cst_52 {dimension_numbers = #tpu.dot_dimension_numbers<[1], [0], [0], [1], [0, 0, 1, 1], [], []>} : vector<64x128xbf16>, vector<128x128xbf16>, vector<64x128xf32> -> vector<64x128xf32>
    %90 = arith.addf %80, %89 : vector<64x128xf32>
    %c48 = arith.constant 48 : index
    %c0_53 = arith.constant 0 : index
    %91 = vector.load %arg9[%c48, %c0_53] : memref<128x128xbf16, #tpu.memory_space<vmem>>, vector<64x128xbf16>
    %c7 = arith.constant 7 : index
    %c0_54 = arith.constant 0 : index
    %c0_55 = arith.constant 0 : index
    %92 = vector.load %arg4[%c7, %c0_54, %c0_55] : memref<9x128x128xbf16, #tpu.memory_space<vmem>>, vector<1x128x128xbf16>
    %93 = vector.shape_cast %92 : vector<1x128x128xbf16> to vector<128x128xbf16>
    %cst_56 = arith.constant dense<0.000000e+00> : vector<64x128xf32>
    %94 = tpu.matmul %91, %93, %cst_56 {dimension_numbers = #tpu.dot_dimension_numbers<[1], [0], [0], [1], [0, 0, 1, 1], [], []>} : vector<64x128xbf16>, vector<128x128xbf16>, vector<64x128xf32> -> vector<64x128xf32>
    %95 = arith.addf %90, %94 : vector<64x128xf32>
    %c49 = arith.constant 49 : index
    %c0_57 = arith.constant 0 : index
    %96 = vector.load %arg9[%c49, %c0_57] : memref<128x128xbf16, #tpu.memory_space<vmem>>, vector<64x128xbf16>
    %cst_58 = arith.constant 0.000000e+00 : f32
    %97 = arith.truncf %cst_58 : f32 to bf16
    %98 = vector.shape_cast %29 : vector<64x1xi1> to vector<64x1xi1>
    %99 = vector.broadcast %98 : vector<64x1xi1> to vector<64x128xi1>
    %100 = vector.broadcast %97 : bf16 to vector<64x128xbf16>
    %101 = arith.select %99, %96, %100 : vector<64x128xi1>, vector<64x128xbf16>
    %c8 = arith.constant 8 : index
    %c0_59 = arith.constant 0 : index
    %c0_60 = arith.constant 0 : index
    %102 = vector.load %arg4[%c8, %c0_59, %c0_60] : memref<9x128x128xbf16, #tpu.memory_space<vmem>>, vector<1x128x128xbf16>
    %103 = vector.shape_cast %102 : vector<1x128x128xbf16> to vector<128x128xbf16>
    %cst_61 = arith.constant dense<0.000000e+00> : vector<64x128xf32>
    %104 = tpu.matmul %101, %103, %cst_61 {dimension_numbers = #tpu.dot_dimension_numbers<[1], [0], [0], [1], [0, 0, 1, 1], [], []>} : vector<64x128xbf16>, vector<128x128xbf16>, vector<64x128xf32> -> vector<64x128xf32>
    %105 = arith.addf %95, %104 : vector<64x128xf32>
    %c0_62 = arith.constant 0 : index
    %c0_63 = arith.constant 0 : index
    %106 = vector.load %arg5[%c0_62, %c0_63] : memref<1x128xf32, #tpu.memory_space<vmem>>, vector<1x128xf32>
    %107 = vector.broadcast %106 : vector<1x128xf32> to vector<64x128xf32>
    %108 = arith.addf %105, %107 : vector<64x128xf32>
    %109 = arith.truncf %108 : vector<64x128xf32> to vector<64x128xbf16>
    %c0_64 = arith.constant 0 : index
    %c0_65 = arith.constant 0 : index
    %c0_66 = arith.constant 0 : index
    %110 = vector.load %arg6[%c0_64, %c0_65, %c0_66] : memref<1x64x128xbf16, #tpu.memory_space<vmem>>, vector<1x64x128xbf16>
    %111 = vector.shape_cast %110 : vector<1x64x128xbf16> to vector<64x128xbf16>
    %112 = vector.shape_cast %109 : vector<64x128xbf16> to vector<1x64x128xbf16>
    tpu.vector_store %arg6[%c0_64, %c0_65, %c0_66], %112 {strides = array<i32>} : memref<1x64x128xbf16, #tpu.memory_space<vmem>>, vector<1x64x128xbf16>,
    %cst_67 = arith.constant dense<0.000000e+00> : vector<128xf32>
    %113 = vector.multi_reduction <add>, %108, %cst_67 [0] : vector<64x128xf32> to vector<128xf32>
    %114 = vector.shape_cast %113 : vector<128xf32> to vector<1x128xf32>
    %cst_68 = arith.constant 1.562500e-02 : f32
    %115 = vector.broadcast %cst_68 : f32 to vector<1x128xf32>
    %116 = arith.mulf %114, %115 : vector<1x128xf32>
    %117 = vector.broadcast %116 : vector<1x128xf32> to vector<64x128xf32>
    %118 = arith.subf %108, %117 : vector<64x128xf32>
    %c0_69 = arith.constant 0 : index
    %c0_70 = arith.constant 0 : index
    %c0_71 = arith.constant 0 : index
    %c0_72 = arith.constant 0 : index
    %119 = vector.load %arg7[%c0_69, %c0_70, %c0_71, %c0_72] : memref<1x1x1x128xf32, #tpu.memory_space<vmem>>, vector<1x1x1x128xf32>
    %120 = vector.shape_cast %119 : vector<1x1x1x128xf32> to vector<1x128xf32>
    %121 = vector.shape_cast %114 : vector<1x128xf32> to vector<1x1x1x128xf32>
    tpu.vector_store %arg7[%c0_69, %c0_70, %c0_71, %c0_72], %121 {strides = array<i32>} : memref<1x1x1x128xf32, #tpu.memory_space<vmem>>, vector<1x1x1x128xf32>,
    %122 = arith.mulf %118, %118 : vector<64x128xf32>
    %cst_73 = arith.constant dense<0.000000e+00> : vector<128xf32>
    %123 = vector.multi_reduction <add>, %122, %cst_73 [0] : vector<64x128xf32> to vector<128xf32>
    %124 = vector.shape_cast %123 : vector<128xf32> to vector<1x128xf32>
    %c0_74 = arith.constant 0 : index
    %c0_75 = arith.constant 0 : index
    %c0_76 = arith.constant 0 : index
    %c0_77 = arith.constant 0 : index
    %125 = vector.load %arg8[%c0_74, %c0_75, %c0_76, %c0_77] : memref<1x1x1x128xf32, #tpu.memory_space<vmem>>, vector<1x1x1x128xf32>
    %126 = vector.shape_cast %125 : vector<1x1x1x128xf32> to vector<1x128xf32>
    %127 = vector.shape_cast %124 : vector<1x128xf32> to vector<1x1x1x128xf32>
    tpu.vector_store %arg8[%c0_74, %c0_75, %c0_76, %c0_77], %127 {strides = array<i32>} : memref<1x1x1x128xf32, #tpu.memory_space<vmem>>, vector<1x1x1x128xf32>,
    return
  }
  func.func @transform_0(%arg0: i32, %arg1: i32) -> (i32, i32, i32) {
    %c0_i32 = arith.constant 0 : i32
    %c0_i32_0 = arith.constant 0 : i32
    return %arg0, %arg1, %c0_i32 : i32, i32, i32
  }
  func.func @transform_1(%arg0: i32, %arg1: i32) -> (i32, i32, i32, i32) {
    %c0_i32 = arith.constant 0 : i32
    %c0_i32_0 = arith.constant 0 : i32
    %c0_i32_1 = arith.constant 0 : i32
    return %arg0, %arg1, %c0_i32, %c0_i32_0 : i32, i32, i32, i32
  }
  func.func @transform_2(%arg0: i32, %arg1: i32) -> (i32, i32, i32) {
    %c0_i32 = arith.constant 0 : i32
    %c0_i32_0 = arith.constant 0 : i32
    %c0_i32_1 = arith.constant 0 : i32
    %c0_i32_2 = arith.constant 0 : i32
    return %c0_i32, %c0_i32_0, %c0_i32_1 : i32, i32, i32
  }
  func.func @transform_3(%arg0: i32, %arg1: i32) -> (i32, i32) {
    %c0_i32 = arith.constant 0 : i32
    %c0_i32_0 = arith.constant 0 : i32
    %c0_i32_1 = arith.constant 0 : i32
    return %c0_i32, %c0_i32_0 : i32, i32
  }
  func.func @transform_4(%arg0: i32, %arg1: i32) -> (i32, i32, i32) {
    %c0_i32 = arith.constant 0 : i32
    %c0_i32_0 = arith.constant 0 : i32
    return %arg0, %arg1, %c0_i32 : i32, i32, i32
  }
  func.func @transform_5(%arg0: i32, %arg1: i32) -> (i32, i32, i32, i32) {
    %c0_i32 = arith.constant 0 : i32
    %c0_i32_0 = arith.constant 0 : i32
    %c0_i32_1 = arith.constant 0 : i32
    return %arg0, %arg1, %c0_i32, %c0_i32_0 : i32, i32, i32, i32
  }
  func.func @transform_6(%arg0: i32, %arg1: i32) -> (i32, i32, i32, i32) {
    %c0_i32 = arith.constant 0 : i32
    %c0_i32_0 = arith.constant 0 : i32
    %c0_i32_1 = arith.constant 0 : i32
    return %arg0, %arg1, %c0_i32, %c0_i32_0 : i32, i32, i32, i32
  }
}

module attributes {stable_mosaic.version = 11 : i64} {
  func.func @_bn_relu_gap_kernel(%arg0: i32, %arg1: i32, %arg2: memref<1x64x128xbf16, #tpu.memory_space<vmem>>, %arg3: memref<1x128xf32, #tpu.memory_space<vmem>>, %arg4: memref<1x128xf32, #tpu.memory_space<vmem>>, %arg5: memref<1x1x1x128xf32, #tpu.memory_space<vmem>>) attributes {dimension_semantics = [#tpu.dimension_semantics<parallel>, #tpu.dimension_semantics<parallel>], iteration_bounds = array<i64: 2, 4>, scalar_prefetch = 0 : i64, scratch_operands = 0 : i64, tpu.core_type = #tpu.core_type<tc>, window_params = [{transform_indices = @transform_0, window_bounds = array<i64: 1, 64, 128>}, {pipeline_mode = #tpu.pipeline_mode<synchronous>, transform_indices = @transform_1, window_bounds = array<i64: 1, 128>}, {pipeline_mode = #tpu.pipeline_mode<synchronous>, transform_indices = @transform_2, window_bounds = array<i64: 1, 128>}, {transform_indices = @transform_3, window_bounds = array<i64: 1, 1, 1, 128>}]} {
    %c0 = arith.constant 0 : index
    %c0_0 = arith.constant 0 : index
    %c0_1 = arith.constant 0 : index
    %0 = vector.load %arg2[%c0, %c0_0, %c0_1] : memref<1x64x128xbf16, #tpu.memory_space<vmem>>, vector<1x64x128xbf16>
    %1 = vector.shape_cast %0 : vector<1x64x128xbf16> to vector<64x128xbf16>
    %2 = arith.extf %1 : vector<64x128xbf16> to vector<64x128xf32>
    %c0_2 = arith.constant 0 : index
    %c0_3 = arith.constant 0 : index
    %3 = vector.load %arg3[%c0_2, %c0_3] : memref<1x128xf32, #tpu.memory_space<vmem>>, vector<1x128xf32>
    %4 = vector.broadcast %3 : vector<1x128xf32> to vector<64x128xf32>
    %5 = arith.mulf %2, %4 : vector<64x128xf32>
    %c0_4 = arith.constant 0 : index
    %c0_5 = arith.constant 0 : index
    %6 = vector.load %arg4[%c0_4, %c0_5] : memref<1x128xf32, #tpu.memory_space<vmem>>, vector<1x128xf32>
    %7 = vector.broadcast %6 : vector<1x128xf32> to vector<64x128xf32>
    %8 = arith.addf %5, %7 : vector<64x128xf32>
    %cst = arith.constant 0.000000e+00 : f32
    %9 = vector.broadcast %cst : f32 to vector<64x128xf32>
    %10 = arith.maximumf %8, %9 : vector<64x128xf32>
    %cst_6 = arith.constant dense<0.000000e+00> : vector<128xf32>
    %11 = vector.multi_reduction <add>, %10, %cst_6 [0] : vector<64x128xf32> to vector<128xf32>
    %12 = vector.shape_cast %11 : vector<128xf32> to vector<1x128xf32>
    %c0_7 = arith.constant 0 : index
    %c0_8 = arith.constant 0 : index
    %c0_9 = arith.constant 0 : index
    %c0_10 = arith.constant 0 : index
    %13 = vector.load %arg5[%c0_7, %c0_8, %c0_9, %c0_10] : memref<1x1x1x128xf32, #tpu.memory_space<vmem>>, vector<1x1x1x128xf32>
    %14 = vector.shape_cast %13 : vector<1x1x1x128xf32> to vector<1x128xf32>
    %15 = vector.shape_cast %12 : vector<1x128xf32> to vector<1x1x1x128xf32>
    tpu.vector_store %arg5[%c0_7, %c0_8, %c0_9, %c0_10], %15 {strides = array<i32>} : memref<1x1x1x128xf32, #tpu.memory_space<vmem>>, vector<1x1x1x128xf32>,
    return
  }
  func.func @transform_0(%arg0: i32, %arg1: i32) -> (i32, i32, i32) {
    %c0_i32 = arith.constant 0 : i32
    %c0_i32_0 = arith.constant 0 : i32
    return %arg0, %arg1, %c0_i32 : i32, i32, i32
  }
  func.func @transform_1(%arg0: i32, %arg1: i32) -> (i32, i32) {
    %c0_i32 = arith.constant 0 : i32
    %c0_i32_0 = arith.constant 0 : i32
    %c0_i32_1 = arith.constant 0 : i32
    return %c0_i32, %c0_i32_0 : i32, i32
  }
  func.func @transform_2(%arg0: i32, %arg1: i32) -> (i32, i32) {
    %c0_i32 = arith.constant 0 : i32
    %c0_i32_0 = arith.constant 0 : i32
    %c0_i32_1 = arith.constant 0 : i32
    return %c0_i32, %c0_i32_0 : i32, i32
  }
  func.func @transform_3(%arg0: i32, %arg1: i32) -> (i32, i32, i32, i32) {
    %c0_i32 = arith.constant 0 : i32
    %c0_i32_0 = arith.constant 0 : i32
    %c0_i32_1 = arith.constant 0 : i32
    return %arg0, %arg1, %c0_i32, %c0_i32_0 : i32, i32, i32, i32
  }
}

module attributes {stable_mosaic.version = 11 : i64} {
  func.func @_epilogue_proj_kernel(%arg0: i32, %arg1: i32, %arg2: memref<1x64x128xbf16, #tpu.memory_space<vmem>>, %arg3: memref<1x1x128xf32, #tpu.memory_space<vmem>>, %arg4: memref<1x64x128xbf16, #tpu.memory_space<vmem>>, %arg5: memref<128x128xbf16, #tpu.memory_space<vmem>>, %arg6: memref<1x128xf32, #tpu.memory_space<vmem>>, %arg7: memref<1x128xf32, #tpu.memory_space<vmem>>, %arg8: memref<1x128xf32, #tpu.memory_space<vmem>>, %arg9: memref<1x64x128xf32, #tpu.memory_space<vmem>>) attributes {dimension_semantics = [#tpu.dimension_semantics<parallel>, #tpu.dimension_semantics<parallel>], iteration_bounds = array<i64: 2, 4>, scalar_prefetch = 0 : i64, scratch_operands = 0 : i64, tpu.core_type = #tpu.core_type<tc>, window_params = [{transform_indices = @transform_0, window_bounds = array<i64: 1, 64, 128>}, {transform_indices = @transform_1, window_bounds = array<i64: 1, 1, 128>}, {transform_indices = @transform_2, window_bounds = array<i64: 1, 64, 128>}, {pipeline_mode = #tpu.pipeline_mode<synchronous>, transform_indices = @transform_3, window_bounds = array<i64: 128, 128>}, {pipeline_mode = #tpu.pipeline_mode<synchronous>, transform_indices = @transform_4, window_bounds = array<i64: 1, 128>}, {pipeline_mode = #tpu.pipeline_mode<synchronous>, transform_indices = @transform_5, window_bounds = array<i64: 1, 128>}, {pipeline_mode = #tpu.pipeline_mode<synchronous>, transform_indices = @transform_6, window_bounds = array<i64: 1, 128>}, {transform_indices = @transform_7, window_bounds = array<i64: 1, 64, 128>}]} {
    %c0 = arith.constant 0 : index
    %c0_0 = arith.constant 0 : index
    %c0_1 = arith.constant 0 : index
    %0 = vector.load %arg2[%c0, %c0_0, %c0_1] : memref<1x64x128xbf16, #tpu.memory_space<vmem>>, vector<1x64x128xbf16>
    %1 = vector.shape_cast %0 : vector<1x64x128xbf16> to vector<64x128xbf16>
    %2 = arith.extf %1 : vector<64x128xbf16> to vector<64x128xf32>
    %c0_2 = arith.constant 0 : index
    %c0_3 = arith.constant 0 : index
    %3 = vector.load %arg7[%c0_2, %c0_3] : memref<1x128xf32, #tpu.memory_space<vmem>>, vector<1x128xf32>
    %4 = vector.broadcast %3 : vector<1x128xf32> to vector<64x128xf32>
    %5 = arith.mulf %2, %4 : vector<64x128xf32>
    %c0_4 = arith.constant 0 : index
    %c0_5 = arith.constant 0 : index
    %6 = vector.load %arg8[%c0_4, %c0_5] : memref<1x128xf32, #tpu.memory_space<vmem>>, vector<1x128xf32>
    %7 = vector.broadcast %6 : vector<1x128xf32> to vector<64x128xf32>
    %8 = arith.addf %5, %7 : vector<64x128xf32>
    %cst = arith.constant 0.000000e+00 : f32
    %9 = vector.broadcast %cst : f32 to vector<64x128xf32>
    %10 = arith.maximumf %8, %9 : vector<64x128xf32>
    %c0_6 = arith.constant 0 : index
    %c0_7 = arith.constant 0 : index
    %c0_8 = arith.constant 0 : index
    %11 = vector.load %arg3[%c0_6, %c0_7, %c0_8] : memref<1x1x128xf32, #tpu.memory_space<vmem>>, vector<1x1x128xf32>
    %12 = vector.shape_cast %11 : vector<1x1x128xf32> to vector<1x128xf32>
    %13 = vector.broadcast %12 : vector<1x128xf32> to vector<64x128xf32>
    %14 = arith.mulf %10, %13 : vector<64x128xf32>
    %c0_9 = arith.constant 0 : index
    %c0_10 = arith.constant 0 : index
    %c0_11 = arith.constant 0 : index
    %15 = vector.load %arg4[%c0_9, %c0_10, %c0_11] : memref<1x64x128xbf16, #tpu.memory_space<vmem>>, vector<1x64x128xbf16>
    %16 = vector.shape_cast %15 : vector<1x64x128xbf16> to vector<64x128xbf16>
    %c0_12 = arith.constant 0 : index
    %c0_13 = arith.constant 0 : index
    %17 = vector.load %arg5[%c0_12, %c0_13] : memref<128x128xbf16, #tpu.memory_space<vmem>>, vector<128x128xbf16>
    %cst_14 = arith.constant dense<0.000000e+00> : vector<64x128xf32>
    %18 = tpu.matmul %16, %17, %cst_14 {dimension_numbers = #tpu.dot_dimension_numbers<[1], [0], [0], [1], [0, 0, 1, 1], [], []>} : vector<64x128xbf16>, vector<128x128xbf16>, vector<64x128xf32> -> vector<64x128xf32>
    %c0_15 = arith.constant 0 : index
    %c0_16 = arith.constant 0 : index
    %19 = vector.load %arg6[%c0_15, %c0_16] : memref<1x128xf32, #tpu.memory_space<vmem>>, vector<1x128xf32>
    %20 = vector.broadcast %19 : vector<1x128xf32> to vector<64x128xf32>
    %21 = arith.addf %18, %20 : vector<64x128xf32>
    %22 = arith.addf %21, %14 : vector<64x128xf32>
    %c0_17 = arith.constant 0 : index
    %c0_18 = arith.constant 0 : index
    %c0_19 = arith.constant 0 : index
    %23 = vector.load %arg9[%c0_17, %c0_18, %c0_19] : memref<1x64x128xf32, #tpu.memory_space<vmem>>, vector<1x64x128xf32>
    %24 = vector.shape_cast %23 : vector<1x64x128xf32> to vector<64x128xf32>
    %25 = vector.shape_cast %22 : vector<64x128xf32> to vector<1x64x128xf32>
    tpu.vector_store %arg9[%c0_17, %c0_18, %c0_19], %25 {strides = array<i32>} : memref<1x64x128xf32, #tpu.memory_space<vmem>>, vector<1x64x128xf32>,
    return
  }
  func.func @transform_0(%arg0: i32, %arg1: i32) -> (i32, i32, i32) {
    %c0_i32 = arith.constant 0 : i32
    %c0_i32_0 = arith.constant 0 : i32
    return %arg0, %arg1, %c0_i32 : i32, i32, i32
  }
  func.func @transform_1(%arg0: i32, %arg1: i32) -> (i32, i32, i32) {
    %c0_i32 = arith.constant 0 : i32
    %c0_i32_0 = arith.constant 0 : i32
    %c0_i32_1 = arith.constant 0 : i32
    return %arg0, %c0_i32, %c0_i32_0 : i32, i32, i32
  }
  func.func @transform_2(%arg0: i32, %arg1: i32) -> (i32, i32, i32) {
    %c0_i32 = arith.constant 0 : i32
    %c0_i32_0 = arith.constant 0 : i32
    return %arg0, %arg1, %c0_i32 : i32, i32, i32
  }
  func.func @transform_3(%arg0: i32, %arg1: i32) -> (i32, i32) {
    %c0_i32 = arith.constant 0 : i32
    %c0_i32_0 = arith.constant 0 : i32
    %c0_i32_1 = arith.constant 0 : i32
    return %c0_i32, %c0_i32_0 : i32, i32
  }
  func.func @transform_4(%arg0: i32, %arg1: i32) -> (i32, i32) {
    %c0_i32 = arith.constant 0 : i32
    %c0_i32_0 = arith.constant 0 : i32
    %c0_i32_1 = arith.constant 0 : i32
    return %c0_i32, %c0_i32_0 : i32, i32
  }
  func.func @transform_5(%arg0: i32, %arg1: i32) -> (i32, i32) {
    %c0_i32 = arith.constant 0 : i32
    %c0_i32_0 = arith.constant 0 : i32
    %c0_i32_1 = arith.constant 0 : i32
    return %c0_i32, %c0_i32_0 : i32, i32
  }
  func.func @transform_6(%arg0: i32, %arg1: i32) -> (i32, i32) {
    %c0_i32 = arith.constant 0 : i32
    %c0_i32_0 = arith.constant 0 : i32
    %c0_i32_1 = arith.constant 0 : i32
    return %c0_i32, %c0_i32_0 : i32, i32
  }
  func.func @transform_7(%arg0: i32, %arg1: i32) -> (i32, i32, i32) {
    %c0_i32 = arith.constant 0 : i32
    %c0_i32_0 = arith.constant 0 : i32
    return %arg0, %arg1, %c0_i32 : i32, i32, i32
  }
}

</mosaic_0001>

<bundles_post_ra>
// kernel: basic_conv_block.6
= control target key start
LH: loop header
LB: loop body
LE: loop exit
PB: predicated region body
PF: predicated region fallthrough
CT: control target
= control target key end

     0   :  { %s567_s12 = smov 0   ;;  %s569_s13 = smov 0   ;;  %s631_s0 = inlined_call_operand.vmem [shape: bf16[2,256,128], index: 0, kind: input, shape index: {}]   ;;  %s632_s1 = inlined_call_operand.vmem [shape: f32[1,128], index: 1, kind: input, shape index: {}]   ;;  %s633_s2 = inlined_call_operand.vmem [shape: f32[1,128], index: 2, kind: input, shape index: {}]   ;;  %s634_s3 = inlined_call_operand.vmem [shape: bf16[2,256,128], index: 3, kind: output, shape index: {}]  }
   0x1   :  { %s571_s14 = smov 0   ;;  %s573_s15 = smov 0  }
   0x2   :  { %s575_s16 = smov 0  }
   0x3 LB: > { %s22_s17 = sadd.s32 1, %s537_s14  ;;  %s25_s18 = sadd.s32 1, %s541_s15  ;;  %s545_s16 = sphi %s575_s16, %s13_s16   ;;  %s541_s15 = sphi %s573_s15, %s638_s15   ;;  %s537_s14 = sphi %s571_s14, %s637_s14   ;;  %s533_s13 = sphi %s569_s13, %s636_s13   ;;  %s529_s12 = sphi %s567_s12, %s635_s12  }
   0x4   : > { %p23_p0 = scmp.ge.s32.totalorder %s22_s17, 4  ;;  %p398_p1 = scmp.ge.s32.totalorder %s545_s16, 1 }
   0x5   : > { %p158_p2 = scmp.lt.s32.totalorder %s545_s16, 9 }
   0x6   : > { %s640_s17 = smov (%p23_p0, %s22_s17), 0  ;;  %s642_s18 = smov (!%p23_p0, %s25_s18), %s541_s15 }
   0x7   : > { %p159_p3 = pnand %p398_p1, %p158_p2  ;;  %p27_p4 = scmp.ge.s32.totalorder %s642_s18, 2 }
   0x8   : > { %s399_s19 = sshll.u32 (!%p159_p3), %s529_s12, 3  ;;  %p191_p5 = scmp.lt.s32.totalorder (!%p159_p3), %s533_s13, 1 }
   0x9   : > { %s644_s18 = smov (%p27_p4, %s642_s18), 0  ;;  %162 = sbr.rel (%p159_p3) target bundleno = 32 (0x20), region = 32 }
   0xa   : > { %p193_p6 = scmp.lt.s32.totalorder (!%p159_p3), %s399_s19, 31 }
   0xe   : > { %s646_s13 = smov (!%p191_p5, %s533_s13), 1  ;;  %s648_s19 = smov (!%p193_p6, %s399_s19), 31  ;;  %v405_v0 = vld [vmem:[%s632_s1] ss:$0 sm:$0xff] }
   0xf   : > { %s400_s20 = sshll.u32 %s646_s13, 5  ;;  %v406_v9 = vld [vmem:[%s633_s2] ss:$0 sm:$0xff] }
  0x10   : > { %s597_s21 = sadd.s32 %s400_s20, %s648_s19 }
  0x11   : > { %s401_s22 = sshll.u32 %s597_s21, 2 }
  0x12   : > { %s198_s25 = scalar_lea.vmem %s631_s0, %s401_s22  ;;  %s208_s5 = scalar_lea.vmem %s634_s3, %s401_s22 }
  0x13   : > { %v426_v1 = vld [vmem:[%s198_s25] sm:$0xff]   ;;  %v461_v2 = vld [vmem:[%s198_s25 + $0x8] sm:$0xff]   ;;  %v462_v3 = vld [vmem:[%s198_s25 + $0x10] sm:$0xff]  }
  0x14   : > { %v427_v4 = vunpack.c.l.bf16 %v426_v1  ;;  %v428_v5 = vunpack.c.h.bf16 %v426_v1  ;;  %v431_v6 = vunpack.c.l.bf16 %v461_v2  ;;  %v432_v7 = vunpack.c.h.bf16 %v461_v2  ;;  %v463_v8 = vld [vmem:[%s198_s25 + $0x18] sm:$0xff]  }
  0x15   : > { %v435_v10 = vunpack.c.l.bf16 %v462_v3  ;;  %v436_v11 = vunpack.c.h.bf16 %v462_v3  ;;  %v439_v12 = vunpack.c.l.bf16 %v463_v8  ;;  %v440_v13 = vunpack.c.h.bf16 %v463_v8 }
  0x16   : > { %v233_v14 = vmul.f32 %v427_v4, %v405_v0  ;;  %v234_v15 = vmul.f32 %v428_v5, %v405_v0  ;;  %v235_v16 = vmul.f32 %v431_v6, %v405_v0  ;;  %v236_v17 = vmul.f32 %v432_v7, %v405_v0 }
  0x17   : > { %v237_v18 = vmul.f32 %v435_v10, %v405_v0  ;;  %v238_v19 = vmul.f32 %v436_v11, %v405_v0  ;;  %v239_v20 = vmul.f32 %v439_v12, %v405_v0  ;;  %v240_v21 = vmul.f32 %v440_v13, %v405_v0 }
  0x18   : > { %v248_v22 = vadd.f32 %v406_v9, %v233_v14  ;;  %v249_v23 = vadd.f32 %v406_v9, %v234_v15  ;;  %v250_v24 = vadd.f32 %v406_v9, %v235_v16  ;;  %v251_v25 = vadd.f32 %v406_v9, %v236_v17 }
  0x19   : > { %v252_v26 = vadd.f32 %v406_v9, %v237_v18  ;;  %v253_v27 = vadd.f32 %v406_v9, %v238_v19  ;;  %v254_v28 = vadd.f32 %v406_v9, %v239_v20  ;;  %v255_v29 = vadd.f32 %v406_v9, %v240_v21 }
  0x1a   : > { %v256_v30 = vmax.f32 %v248_v22, 0.0  ;;  %v257_v31 = vmax.f32 %v249_v23, 0.0  ;;  %v258_v32 = vmax.f32 %v250_v24, 0.0  ;;  %v259_v33 = vmax.f32 %v251_v25, 0.0 }
  0x1b   : > { %v260_v34 = vmax.f32 %v252_v26, 0.0  ;;  %v261_v35 = vmax.f32 %v253_v27, 0.0  ;;  %v262_v36 = vmax.f32 %v254_v28, 0.0  ;;  %v263_v37 = vmax.f32 %v255_v29, 0.0 }
  0x1c   : > { %v444_v38 = vpack.c.bf16 %v257_v31, %v256_v30  ;;  %v449_v39 = vpack.c.bf16 %v259_v33, %v258_v32 }
  0x1d   : > { %v454_v40 = vpack.c.bf16 %v261_v35, %v260_v34  ;;  %v459_v41 = vpack.c.bf16 %v263_v37, %v262_v36 }
  0x1e   : > { %445 = vst [vmem:[%s208_s5] sm:$0xff] %v444_v38   ;;  %464 = vst [vmem:[%s208_s5 + $0x8] sm:$0xff] %v449_v39  }
  0x1f   : > { %465 = vst [vmem:[%s208_s5 + $0x10] sm:$0xff] %v454_v40   ;;  %466 = vst [vmem:[%s208_s5 + $0x18] sm:$0xff] %v459_v41  }
  0x20 PF: > { %s13_s16 = sadd.s32 1, %s545_s16   ;;  %s635_s12 = smov %s537_s14 }
  0x21   : > { %p10_p7 = scmp.ge.s32.totalorder %s13_s16, 10   ;;  %s636_s13 = smov %s541_s15 }
  0x22   : > { %s637_s14 = smov %s640_s17  ;;  %s638_s15 = smov %s644_s18 }
  0x23   :  { %12 = sbr.rel (!%p10_p7) target bundleno = 3 (0x3), region = 62 }

// kernel: basic_conv_block.5
= control target key start
LH: loop header
LB: loop body
LE: loop exit
PB: predicated region body
PF: predicated region fallthrough
CT: control target
= control target key end

     0   :  { %s3704_s21 = smov 0   ;;  %s3706_s22 = smov 0   ;;  %s4496_s0 = inlined_call_operand.vmem [shape: bf16[2,256,128], index: 0, kind: input, shape index: {}]   ;;  %s4497_s1 = inlined_call_operand.vmem [shape: bf16[2,4,64,128], index: 1, kind: input, shape index: {}]   ;;  %s4498_s2 = inlined_call_operand.vmem [shape: bf16[9,128,128], index: 2, kind: input, shape index: {}]   ;;  %s4499_s3 = inlined_call_operand.vmem [shape: f32[1,128], index: 3, kind: input, shape index: {}]   ;;  %s4500_s4 = inlined_call_operand.vmem [shape: bf16[2,256,128], index: 4, kind: output, shape index: {0}]   ;;  %s4501_s5 = inlined_call_operand.vmem [shape: f32[2,4,1,128], index: 5, kind: output, shape index: {1}]   ;;  %s4502_s6 = inlined_call_operand.vmem [shape: f32[2,4,1,128], index: 6, kind: output, shape index: {2}]  }
   0x1   :  { %s3708_s23 = smov 0   ;;  %s3710_s24 = smov 0  }
   0x2   :  { %s3712_s25 = smov 0  }
   0x3 LB: > { %s26_s26 = sadd.s32 1, %s3657_s23  ;;  %s29_s27 = sadd.s32 1, %s3661_s24  ;;  %s3665_s25 = sphi %s3712_s25, %s17_s25   ;;  %s3661_s24 = sphi %s3710_s24, %s4542_s24   ;;  %s3657_s23 = sphi %s3708_s23, %s4541_s23   ;;  %s3653_s22 = sphi %s3706_s22, %s4540_s22   ;;  %s3649_s21 = sphi %s3704_s21, %s4539_s21  }
   0x4   : > { %p27_p0 = scmp.ge.s32.totalorder %s26_s26, 4  ;;  %p2862_p1 = scmp.ge.s32.totalorder %s3665_s25, 1 }
   0x5   : > { %p258_p2 = scmp.lt.s32.totalorder %s3665_s25, 9 }
   0x6   : > { %s4544_s26 = smov (%p27_p0, %s26_s26), 0  ;;  %s4546_s27 = smov (!%p27_p0, %s29_s27), %s3661_s24 }
   0x7   : > { %p259_p3 = pnand %p2862_p1, %p258_p2  ;;  %p31_p4 = scmp.ge.s32.totalorder %s4546_s27, 2 }
   0x9   : > { %s4548_s27 = smov (%p31_p4, %s4546_s27), 0  ;;  %262 = sbr.rel (%p259_p3) target bundleno = 446 (0x1be), region = 36 }
   0xe   : > { %v3540_v0 = vld [vmem:[%s4498_s2 + $0x78] sm:$0xff]   ;;  %s2863_s30 = sshll.u32 %s3649_s21, 3  ;;  %p320_p5 = scmp.lt.s32.totalorder %s3653_s22, 1  ;;  %v3542_v2 = vld [vmem:[%s4498_s2 + $0x70] sm:$0xff]   ;;  %v3544_v4 = vld [vmem:[%s4498_s2 + $0x68] sm:$0xff]   ;;  %v397_v5 = vlaneseq  ;;  %vm3667_vm5 = vmmov 1  }
   0xf   : > { %v3541_v1 = vld [vmem:[%s4498_s2 + $0x38] sm:$0xff]   ;;  %3266 = vmatprep.subr.bf16.mxu0 %v3540_v0  ;;  %p322_p6 = scmp.lt.s32.totalorder %s2863_s30, 31  ;;  %v3543_v3 = vld [vmem:[%s4498_s2 + $0x30] sm:$0xff]   ;;  %v3545_v6 = vld [vmem:[%s4498_s2 + $0x28] sm:$0xff]   ;;  %p331_p7 = scmp.lt.s32.totalorder %s3649_s21, 3  ;;  %v3668_v25 = vmov 0  }
  0x10   : > { %3290 = vmatprep.subr.bf16.mxu1 %v3541_v1  ;;  %3267 = vmatpush3.bf16.msra.mxu0 %v3540_v0  ;;  %s4550_s22 = smov (!%p320_p5, %s3653_s22), 1  ;;  %v3546_v7 = vld [vmem:[%s4498_s2 + $0x60] sm:$0xff]   ;;  %v3764_v8 = vshrl.u32 %v397_v5, 7  ;;  %v3548_v11 = vld [vmem:[%s4498_s2 + $0x58] sm:$0xff]   ;;  %v3550_v14 = vld [vmem:[%s4498_s2 + $0x50] sm:$0xff]  }
  0x11   : > { %3291 = vmatpush3.bf16.msra.mxu1 %v3541_v1  ;;  %3268 = vmatprep.subr.bf16.mxu0 %v3542_v2  ;;  %s4552_s30 = smov (!%p322_p6, %s2863_s30), 31  ;;  %s2864_s17 = sshll.u32 %s4550_s22, 5  ;;  %v3547_v9 = vld [vmem:[%s4498_s2 + $0x20] sm:$0xff]   ;;  %v3549_v13 = vld [vmem:[%s4498_s2 + $0x18] sm:$0xff]   ;;  %v3551_v16 = vld [vmem:[%s4498_s2 + $0x10] sm:$0xff]  }
  0x12   : > { %3292 = vmatprep.subr.bf16.mxu1 %v3543_v3  ;;  %s3759_s18 = sadd.s32 %s2864_s17, %s4552_s30  ;;  %s4554_s21 = smov (!%p331_p7, %s3649_s21), 3  ;;  %v400_v10 = vadd.s32 16, %v3764_v8  ;;  %v410_v12 = vand.u32 15, %v3764_v8  ;;  %vm559_vm3 = vsmask.f32 3328  ;;  %vm544_vm6 = vmpackc.low %vm3667_vm5, %vm3667_vm5  ;;  %v3552_v27 = vld [vmem:[%s4498_s2 + $0x48] sm:$0xff]  }
  0x13   : > { %s2865_s30 = sshll.u32 %s3759_s18, 2  ;;  %s2866_s7 = sshll.u32 %s4554_s21, 3  ;;  %vm560_vm4 = vsmask.f32 7440  ;;  %v3819_v28 = vsel %vm544_vm6, 65537, %v3668_v25  ;;  %v402_v31 = vadd.s32 32, %v3764_v8 }
  0x14   : > { %3269 = vmatpush3.bf16.msra.mxu0 %v3542_v2  ;;  %s335_s10 = sadd.s32 %s2866_s7, %s2864_s17  ;;  %s327_s15 = scalar_lea.vmem %s4496_s0, %s2865_s30  ;;  %v424_v15 = vand.u32 15, %v400_v10  ;;  %vm3798_vm0 = vcmp.ne.s32.totalorder %v410_v12, 0  ;;  %v3553_v32 = vld [vmem:[%s4498_s2 + $0x8] sm:$0xff]   ;;  %v572_v34 = vshll.u32 %v3819_v28, 16  ;;  %v576_v35 = vshrl.u32 %v3819_v28, 16  ;;  %v3554_v42 = vld [vmem:[%s4498_s2 + $0x40] sm:$0xff]   ;;  %vm3843_vm8 = vmor %vm559_vm3, %vm560_vm4 }
  0x15   : > { %3293 = vmatpush3.bf16.msra.mxu1 %v3543_v3  ;;  %3270 = vmatprep.subr.bf16.mxu0 %v3544_v4  ;;  %s2868_s16 = sshll.u32 %s335_s10, 2  ;;  %v373_v20 = vld [vmem:[%s327_s15] sm:$0xff]   ;;  %v375_v21 = vld [vmem:[%s327_s15 + $0x8] sm:$0xff]   ;;  %v377_v22 = vld [vmem:[%s327_s15 + $0x10] sm:$0xff]   ;;  %v438_v46 = vand.u32 15, %v402_v31  ;;  %v3852_v57 = vadd.s32 48, %v3764_v8  ;;  %s346_s20 = scalar_lea.vmem %s4500_s4, %s2865_s30 }
  0x16   : > { %3294 = vmatprep.subr.bf16.mxu1 %v3545_v6  ;;  %s3793_s17 = scalar_lea.vmem %s4497_s1, %s2868_s16  ;;  %381 = vst [vmem:[#allocation2 + $0x10] sm:$0xff] %v373_v20   ;;  %vm3804_vm1 = vcmp.ne.s32.totalorder %v424_v15, 0  ;;  %383 = vst [vmem:[#allocation2 + $0x18] sm:$0xff] %v375_v21   ;;  %v379_v24 = vld [vmem:[%s327_s15 + $0x18] sm:$0xff]   ;;  %v3832_v40 = vrot.slane %v572_v34, 5  ;;  %v578_v41 = vrot.slane %v576_v35, 4 }
  0x17   : > { %v365_v18 = vld [vmem:[%s3793_s17] sm:$0xff]   ;;  %v367_v19 = vld [vmem:[%s3793_s17 + $0x8] sm:$0xff]   ;;  %385 = vst [vmem:[#allocation2 + $0x20] sm:$0xff] %v377_v22   ;;  %vm543_vm2 = vmpackc.low %vm3798_vm0, %vm3798_vm0  ;;  %vm3859_vm10 = vcmp.ne.s32.totalorder %v438_v46, 0  ;;  %vm852_vm13 = vsmask.f32 4352 }
  0x18   : > { %3271 = vmatpush3.bf16.msra.mxu0 %v3544_v4  ;;  %369 = vst [vmem:[#allocation2] sm:$0xff] %v365_v18   ;;  %371 = vst [vmem:[#allocation2 + $0x8] sm:$0xff] %v367_v19   ;;  %v551_v26 = vsel %vm543_vm2, 65537, %v3668_v25  ;;  %v3555_v47 = vld [vmem:[%s4498_s2] sm:$0xff]   ;;  %v579_v50 = vor.u32 %v578_v41, %v3832_v40  ;;  %v3560_v62 = vld [vmem:[%s4498_s2 + $0xb8] sm:$0xff]   ;;  %v3897_v17 = vrot.slane %v576_v35, 7 }
  0x19   : > { %3295 = vmatpush3.bf16.msra.mxu1 %v3545_v6  ;;  %3272 = vmatprep.subr.bf16.mxu0 %v3546_v7  ;;  %387 = vst [vmem:[#allocation2 + $0x28] sm:$0xff] %v379_v24   ;;  %vm545_vm7 = vmpackc.low %vm3804_vm1, %vm3804_vm1  ;;  %v563_v29 = vshll.u32 %v551_v26, 16  ;;  %v566_v30 = vshrl.u32 %v551_v26, 16  ;;  %v3869_v63 = vld [vmem:[%s4498_s2 + $0xf8] sm:$0xff]   ;;  %v3566_v6 = vld [vmem:[%s4498_s2 + $0xa0] sm:$0xff]   ;;  %v401_v49 = vadd.s32 24, %v3764_v8 }
  0x1a   : > { %3296 = vmatprep.subr.bf16.mxu1 %v3547_v9  ;;  %v553_v33 = vsel %vm545_vm7, 65537, %v3668_v25  ;;  %v3849_v55 = vrot.slane %v579_v50, 4  ;;  %vm547_vm15 = vmpackc.low %vm3859_vm10, %vm3859_vm10  ;;  %s2872_s18 = sshll.u32 %s4550_s22, 2 }
  0x1b   : > { %v3828_v36 = vrot.slane %v563_v29, 5  ;;  %v568_v37 = vrot.slane %v566_v30, 4  ;;  %v582_v38 = vshll.u32 %v553_v33, 16  ;;  %v586_v39 = vshrl.u32 %v553_v33, 16  ;;  %s4471_s30 = sadd.s32 %s2872_s18, %s4554_s21 }
  0x1c   : > { %3273 = vmatpush3.bf16.msra.mxu0 %v3546_v7  ;;  %vm649_vm3 = vcmp.ne.s16.totalorder %v3849_v55, 0  ;;  %s354_s7 = scalar_lea.vmem %s4501_s5, %s4471_s30  ;;  %s361_s8 = scalar_lea.vmem %s4502_s6, %s4471_s30 }
  0x1d   : > { %3297 = vmatpush3.bf16.msra.mxu1 %v3547_v9  ;;  %3274 = vmatprep.subr.bf16.mxu0 %v3548_v11  ;;  %v569_v45 = vor.u32 %v568_v37, %v3828_v36  ;;  %v584_v51 = vrot.slane %v582_v38, 5  ;;  %v588_v52 = vrot.slane %v586_v39, 4  ;;  %vm641_vm9 = vcmp.ne.s16.totalorder %v3828_v36, 0  ;;  %v1957_v60 = vld [vmem:[#allocation2 + $0x14] sm:$0x8] }
  0x1e   : > { %3298 = vmatprep.subr.bf16.mxu1 %v3549_v13  ;;  %v1958_v3 = vld [vmem:[#allocation2 + $0x18] sm:$0xf]  ;;  %v1959_v4 = vld [vmem:[#allocation2 + $0x1c] sm:$0xf]  ;;  %v521_v5 = vld [vmem:[#allocation2 + $0x10] sm:$0xf] }
  0x1f   : > { %v518_v43 = vld [vmem:[#allocation2 + $0x4] sm:$0x8]  ;;  %v519_v44 = vld [vmem:[#allocation2 + $0x8] sm:$0xf]  ;;  %v520_v48 = vld [vmem:[#allocation2 + $0xc] sm:$0xf]  ;;  %v589_v56 = vor.u32 %v588_v52, %v584_v51  ;;  %v585_v0 = vsel %vm3843_vm8, %v3849_v55, %v584_v51 }
  0x20   : > { %3275 = vmatpush3.bf16.msra.mxu0 %v3548_v11  ;;  %v570_v53 = vrot.slane %v569_v45, 4  ;;  %v2890_v54 = vcombine.low %v519_v44, %v520_v48  ;;  %v650_v59 = vsel %vm641_vm9, %v518_v43, 0  ;;  %vm3878_vm12 = vcmp.ne.s16.totalorder %v585_v0, 0  ;;  %v1349_v9 = vld [vmem:[#allocation2 + $0xc] sm:$0x8]  ;;  %v3562_v39 = vld [vmem:[%s4498_s2 + $0xb0] sm:$0xff]  }
  0x21   : > { %3299 = vmatpush3.bf16.msra.mxu1 %v3549_v13  ;;  %3276 = vmatprep.subr.bf16.mxu0 %v3550_v14  ;;  %v590_v1 = vrot.slane %v589_v56, 4  ;;  %v652_v11 = vsel %vm3878_vm12, %v520_v48, 0  ;;  %v3889_v13 = vld [vmem:[#allocation2 + $0x10] sm:$0xf]  ;;  %v1966_v15 = vsel %vm641_vm9, %v1957_v60, 0  ;;  %v1968_v19 = vsel %vm3878_vm12, %v1959_v4, 0 }
  0x22   : > { %3300 = vmatprep.subr.bf16.mxu1 %v3551_v16  ;;  %v575_v58 = vsel %vm3843_vm8, %v570_v53, %v3832_v40  ;;  %3282 = vmatprep.mubr.bf16.mxu0 %v2890_v54  ;;  %v3907_v23 = vsel %vm641_vm9, %v1349_v9, 0  ;;  %v3909_v24 = vld [vmem:[#allocation2 + $0x14] sm:$0xf]  ;;  %v555_v37 = vsel %vm547_vm15, 65537, %v3668_v25  ;;  %v3564_v51 = vld [vmem:[%s4498_s2 + $0xa8] sm:$0xff]   ;;  %v452_v52 = vand.u32 15, %v3852_v57 }
  0x23   : > { %vm3874_vm11 = vcmp.ne.s16.totalorder %v575_v58, 0  ;;  %v595_v10 = vsel %vm3843_vm8, %v590_v1, %v3832_v40  ;;  %v2891_v38 = vcombine.low %v521_v5, %v3909_v24  ;;  %v3929_v41 = vld [vmem:[#allocation2 + $0x14] sm:$0xf]  ;;  %v606_v43 = vshrl.u32 %v555_v37, 16  ;;  %v3937_v53 = vld [vmem:[#allocation2 + $0x18] sm:$0xf] }
  0x24   : > { %3277 = vmatpush3.bf16.msra.mxu0 %v3550_v14  ;;  %v651_v7 = vsel %vm3874_vm11, %v519_v44, 0  ;;  %v1960_v14 = vld [vmem:[#allocation2 + $0x20] sm:$0xf]  ;;  %vm3893_vm14 = vcmp.ne.s16.totalorder %v595_v10, 0  ;;  %v1967_v18 = vsel %vm3874_vm11, %v1958_v3, 0  ;;  %vm508_vm1 = vcmp.ne.s32.totalorder %v452_v52, 0 }
  0x25   : > { %3301 = vmatpush3.bf16.msra.mxu1 %v3551_v16  ;;  %3278 = vmatprep.subr.bf16.mxu0 %v3552_v27  ;;  %v2902_v12 = vcombine.low %v650_v59, %v651_v7  ;;  %v653_v20 = vsel %vm3893_vm14, %v521_v5, 0  ;;  %v1969_v29 = vsel %vm3893_vm14, %v1960_v14, 0  ;;  %v3920_v30 = vcombine.low %v1966_v15, %v1967_v18  ;;  %v1961_v54 = vld [vmem:[#allocation2 + $0x24] sm:$0xf]  ;;  %v523_v61 = vld [vmem:[#allocation2 + $0x18] sm:$0xf]  ;;  %vm549_vm2 = vmpackc.low %vm508_vm1, %vm508_vm1 }
  0x26   : > { %3302 = vmatprep.subr.bf16.mxu1 %v3553_v32  ;;  %v2903_v26 = vcombine.low %v652_v11, %v653_v20  ;;  %v3922_v33 = vcombine.low %v1968_v19, %v1969_v29  ;;  %v608_v48 = vrot.slane %v606_v43, 4  ;;  %v1360_v59 = vsel %vm3878_vm12, %v3929_v41, 0  ;;  %v3951_v57 = vld [vmem:[#allocation2 + $0x1c] sm:$0xf]  ;;  %v1962_v1 = vld [vmem:[#allocation2 + $0x28] sm:$0xf] }
  0x27   : > { %v854_v21 = vshrl.u32 %v2902_v12, 16  ;;  %v857_v22 = vshll.u32 %v2902_v12, 16  ;;  %v3953_v3 = vld [vmem:[#allocation2 + $0x1c] sm:$0xf]  ;;  %v3964_v7 = vld [vmem:[#allocation2 + $0x20] sm:$0xf] }
  0x28   : > { %3279 = vmatpush3.bf16.msra.mxu0 %v3552_v27  ;;  %v1359_v27 = vsel %vm3874_vm11, %v3889_v13, 0  ;;  %v862_v35 = vshrl.u32 %v2903_v26, 16  ;;  %v865_v36 = vshll.u32 %v2903_v26, 16  ;;  %v557_v9 = vsel %vm549_vm2, 65537, %v3668_v25  ;;  %v3971_v12 = vld [vmem:[#allocation2 + $0x20] sm:$0xf] }
  0x29   : > { %3303 = vmatpush3.bf16.msra.mxu1 %v3553_v32  ;;  %3280 = vmatprep.subr.bf16.mxu0 %v3554_v42  ;;  %v856_v31 = vrot.slane %v854_v21, 3  ;;  %v859_v32 = vrot.slane %v857_v22, 4  ;;  %v2892_v10 = vcombine.low %v523_v61, %v3953_v3  ;;  %v622_v14 = vshll.u32 %v557_v9, 16  ;;  %v390_v18 = vld [vmem:[%s3793_s17 + $0x14] sm:$0xf]  ;;  %v3568_v16 = vld [vmem:[%s4498_s2 + $0x98] sm:$0xff]  }
  0x2a   : > { %3304 = vmatprep.subr.bf16.mxu1 %v3555_v47  ;;  %v864_v44 = vrot.slane %v862_v35, 3  ;;  %v867_v45 = vrot.slane %v865_v36, 4  ;;  %v626_v15 = vshrl.u32 %v557_v9, 16  ;;  %v526_v19 = vld [vmem:[#allocation2 + $0x24] sm:$0xf]  ;;  %v1361_v20 = vsel %vm3893_vm14, %v3937_v53, 0 }
  0x2b   : > { %v860_v46 = vor.u32 %v859_v32, %v856_v31  ;;  %394 = vst [vmem:[#allocation2 + $0x34] sm:$0xf] %v390_v18  ;;  %v658_v22 = vsel %vm649_vm3, %v526_v19, 0  ;;  %v624_v31 = vrot.slane %v622_v14, 5  ;;  %v4018_v52 = vld [vmem:[#allocation2 + $0x24] sm:$0xf] }
  0x2c   : > { %3281 = vmatpush3.bf16.msra.mxu0 %v3554_v42  ;;  %v602_v42 = vshll.u32 %v555_v37, 16  ;;  %v3931_v50 = vor.u32 %v867_v45, %v864_v44  ;;  %v628_v37 = vrot.slane %v626_v15, 4  ;;  %v399_v9 = vadd.s32 8, %v3764_v8 }
  0x2d   : > { %3305 = vmatpush3.bf16.msra.mxu1 %v3555_v47  ;;  %3314 = vmatprep.subr.bf16.mxu0 %v3560_v62  ;;  %v4068_v14 = vrot.slane %v3897_v17, 4  ;;  %vm1056_vm9 = vsmask.f32 4368  ;;  %vm1187_vm2 = vsmask.f32 7424 }
  0x2e   : > { %3338 = vmatprep.subr.bf16.mxu1 %v3869_v63  ;;  %v604_v47 = vrot.slane %v602_v42, 5  ;;  %v869_v60 = vsel %vm852_vm13, %v860_v46, %v3931_v50  ;;  %v3999_v42 = vld [vmem:[#allocation2 + $0x2c] sm:$0xf]  ;;  %v629_v46 = vor.u32 %v628_v37, %v624_v31 }
  0x2f   : > { %3283 = vmatmul.mubr.bf16.vlgmr.msra.gmra.mxu0 %v2891_v38  ;;  %3306 = vmatprep.mubr.bf16.mxu1 %v869_v60  ;;  %v625_v38 = vsel %vm3843_vm8, %v3849_v55, %v624_v31  ;;  %v4035_v28 = vsel %vm649_vm3, %v3999_v42, 0 }
  0x30   : > { %3315 = vmatpush3.bf16.msra.mxu0 %v3560_v62  ;;  %v605_v56 = vsel %vm3843_vm8, %v3849_v55, %v604_v47  ;;  %v609_v58 = vor.u32 %v608_v48, %v604_v47  ;;  %3286 = vmatprep.mubr.bf16.mxu0 %v2892_v10  ;;  %v3572_v47 = vld [vmem:[%s4498_s2 + $0x90] sm:$0xff]   ;;  %v4012_v48 = vcombine.low %v3907_v23, %v1359_v27  ;;  %vm4014_vm5 = vcmp.ne.s16.totalorder %v625_v38, 0  ;;  %v3595_v55 = vld [vmem:[%s4498_s2 + $0x1b8] sm:$0xff]  }
  0x31   : > { %3316 = vmatprep.subr.bf16.mxu0 %v3562_v39  ;;  %vm3947_vm0 = vcmp.ne.s16.totalorder %v605_v56, 0  ;;  %v4023_v56 = vor.u32 %v3897_v17, %v572_v34  ;;  %v630_v60 = vrot.slane %v629_v46, 4  ;;  %v4025_v23 = vcombine.low %v1360_v59, %v1361_v20  ;;  %v3563_v62 = vld [vmem:[%s4498_s2 + $0xf0] sm:$0xff]   ;;  %v3565_v20 = vld [vmem:[%s4498_s2 + $0xe8] sm:$0xff]  }
  0x32   : > { %v610_v0 = vrot.slane %v609_v58, 4  ;;  %v654_v4 = vsel %vm3947_vm0, %v3909_v24, 0  ;;  %v1970_v5 = vsel %vm3947_vm0, %v1961_v54, 0  ;;  %v2893_v24 = vcombine.low %v3964_v7, %v526_v19 }
  0x33   : > { %v1362_v35 = vsel %vm3947_vm0, %v3951_v57, 0  ;;  %v635_v59 = vsel %vm3843_vm8, %v630_v60, %v3832_v40  ;;  %vm1129_vm7 = vcmp.ne.s16.totalorder %v4023_v56, 0  ;;  %v431_v19 = vand.u32 15, %v401_v49 }
  0x34   : > { %3317 = vmatpush3.bf16.msra.mxu0 %v3562_v39  ;;  %v615_v11 = vsel %vm3843_vm8, %v610_v0, %v3832_v40  ;;  %v2906_v39 = vcombine.low %v658_v22, %v658_v22  ;;  %vm4049_vm6 = vcmp.ne.s16.totalorder %v635_v59, 0  ;;  %v1014_v40 = vld [vmem:[#allocation2 + $0x8] sm:$0xf]  ;;  %vm1055_vm8 = vsmask.f32 256 }
  0x35   : > { %3318 = vmatprep.subr.bf16.mxu0 %v3564_v51  ;;  %vm3977_vm4 = vcmp.ne.s16.totalorder %v615_v11, 0  ;;  %v657_v10 = vsel %vm4049_vm6, %v3964_v7, 0  ;;  %v3574_v11 = vld [vmem:[%s4498_s2 + $0x88] sm:$0xff]   ;;  %v4076_v7 = vsel %vm1129_vm7, %v1014_v40, 0  ;;  %v403_v17 = vadd.s32 40, %v3764_v8  ;;  %vm4100_vm1 = vmor %vm1055_vm8, %vm1056_vm9 }
  0x36   : > { %v655_v26 = vsel %vm3977_vm4, %v523_v61, 0  ;;  %v1971_v29 = vsel %vm3977_vm4, %v1962_v1, 0  ;;  %v1363_v43 = vsel %vm3977_vm4, %v3971_v12, 0  ;;  %v889_v54 = vshrl.u32 %v2906_v39, 16 }
  0x37   : > { %v2904_v32 = vcombine.low %v654_v4, %v655_v26  ;;  %v3994_v36 = vcombine.low %v1970_v5, %v1971_v29  ;;  %3287 = vmatmul.mubr.bf16.gmra.mxu0 %v2893_v24  ;;  %v892_v61 = vshll.u32 %v2906_v39, 16  ;;  %v4027_v27 = vcombine.low %v1362_v35, %v1363_v43 }
  0x38   : > { %3319 = vmatpush3.bf16.msra.mxu0 %v3564_v51  ;;  %v4037_v34 = vrot.slane %v889_v54, 3  ;;  %v656_v1 = vsel %vm4014_vm5, %v3953_v3, 0  ;;  %vm513_vm11 = vcmp.ne.s32.totalorder %v431_v19, 15  ;;  %v445_v24 = vand.u32 15, %v403_v17 }
  0x39   : > { %3320 = vmatprep.subr.bf16.mxu0 %v3566_v6  ;;  %v871_v44 = vshrl.u32 %v2904_v32, 16  ;;  %v874_v45 = vshll.u32 %v2904_v32, 16  ;;  %v4047_v4 = vrot.slane %v892_v61, 4  ;;  %v2905_v15 = vcombine.low %v656_v1, %v657_v10  ;;  %vm1042_vm14 = vmpackc.low %vm513_vm11, %vm513_vm11 }
  0x3a   : > { %v1408_v26 = vshrl.u32 %v4012_v48, 16  ;;  %v1411_v29 = vshll.u32 %v4012_v48, 16  ;;  %v1419_v37 = vshll.u32 %v4025_v23, 16  ;;  %v1050_v38 = vsel %vm1042_vm14, 65537, %v3668_v25 }
  0x3b   : > { %v873_v58 = vrot.slane %v871_v44, 3  ;;  %v876_v2 = vrot.slane %v874_v45, 4  ;;  %v895_v18 = vor.u32 %v4047_v4, %v4037_v34  ;;  %v880_v21 = vshrl.u32 %v2905_v15, 16  ;;  %v3567_v44 = vld [vmem:[%s4498_s2 + $0xe0] sm:$0xff]   ;;  %v1016_v34 = vld [vmem:[#allocation2 + $0x10] sm:$0xf] }
  0x3c   : > { %3321 = vmatpush3.bf16.msra.mxu0 %v3566_v6  ;;  %v1364_v6 = vsel %vm4014_vm5, %v4018_v52, 0  ;;  %v883_v22 = vshll.u32 %v2905_v15, 16  ;;  %vm515_vm15 = vcmp.ne.s32.totalorder %v445_v24, 15  ;;  %v1085_v46 = vshrl.u32 %v1050_v38, 16 }
  0x3d   : > { %3322 = vmatprep.subr.bf16.mxu0 %v3568_v16  ;;  %v4039_v0 = vor.u32 %v876_v2, %v873_v58  ;;  %v882_v31 = vrot.slane %v880_v21, 3  ;;  %vm1044_vm0 = vmpackc.low %vm515_vm15, %vm515_vm15  ;;  %v1410_v48 = vrot.slane %v1408_v26, 3  ;;  %v1413_v2 = vrot.slane %v1411_v29, 4  ;;  %v1019_v26 = vld [vmem:[#allocation2 + $0x1c] sm:$0xf] }
  0x3e   : > { %v885_v32 = vrot.slane %v883_v22, 4  ;;  %v1052_v58 = vsel %vm1044_vm0, 65537, %v3668_v25  ;;  %v1087_v1 = vrot.slane %v1085_v46, 7  ;;  %v1425_v22 = vshrl.u32 %v4027_v27, 16 }
  0x3f   : > { %v878_v3 = vsel %vm852_vm13, %v3931_v50, %v4039_v0  ;;  %v417_v50 = vand.u32 15, %v399_v9  ;;  %v1103_v4 = vshrl.u32 %v1052_v58, 16  ;;  %v4107_v9 = vld [vmem:[%s4498_s2 + $0x138] sm:$0xff]   ;;  %v1106_v40 = vshll.u32 %v1052_v58, 16 }
  0x40   : > { %3323 = vmatpush3.bf16.msra.mxu0 %v3568_v16  ;;  %3307 = vmatmul.mubr.bf16.vlgmr.msra.gmra.mxu1 %v878_v3  ;;  %v1416_v16 = vshrl.u32 %v4025_v23, 16  ;;  %v886_v45 = vor.u32 %v885_v32, %v882_v31  ;;  %v3569_v3 = vld [vmem:[%s4498_s2 + $0xd8] sm:$0xff]   ;;  %v1414_v21 = vor.u32 %v1413_v2, %v1410_v48  ;;  %v4161_v48 = vld [vmem:[#allocation2 + $0x28] sm:$0xf]  ;;  %v2353_v31 = vld [vmem:[#allocation2 + $0x34] sm:$0xf] }
  0x41   : > { %3324 = vmatprep.subr.bf16.mxu0 %v3572_v47  ;;  %3339 = vmatpush3.bf16.msra.mxu1 %v3869_v63  ;;  %vm511_vm10 = vcmp.ne.s32.totalorder %v417_v50, 15  ;;  %v3576_v63 = vld [vmem:[%s4498_s2 + $0x80] sm:$0xff]   ;;  %v4112_v15 = vrot.slane %v1103_v4, 7  ;;  %v1017_v50 = vld [vmem:[#allocation2 + $0x14] sm:$0xf]  ;;  %v1427_v4 = vrot.slane %v1425_v22, 3 }
  0x42   : > { %3340 = vmatprep.subr.bf16.mxu1 %v3563_v62  ;;  %vm1040_vm12 = vmpackc.low %vm511_vm10, %vm511_vm10  ;;  %v1418_v60 = vrot.slane %v1416_v16, 3  ;;  %v887_v61 = vsel %vm852_vm13, %v4039_v0, %v886_v45  ;;  %v896_v23 = vsel %vm852_vm13, %v886_v45, %v895_v18  ;;  %v1421_v18 = vrot.slane %v1419_v37, 4  ;;  %v3573_v16 = vld [vmem:[%s4498_s2 + $0xd0] sm:$0xff]  }
  0x43   : > { %v1048_v35 = vsel %vm1040_vm12, 65537, %v3668_v25  ;;  %3310 = vmatprep.mubr.bf16.mxu1 %v887_v61  ;;  %v1108_v37 = vor.u32 %v1106_v40, %v4112_v15 }
  0x44   : > { %3325 = vmatpush3.bf16.msra.mxu0 %v3572_v47  ;;  %v1067_v39 = vshrl.u32 %v1048_v35, 16  ;;  %v1070_v43 = vshll.u32 %v1048_v35, 16  ;;  %v1088_v47 = vshll.u32 %v1050_v38, 16 }
  0x45   : > { %3326 = vmatprep.subr.bf16.mxu0 %v3574_v11  ;;  %3341 = vmatpush3.bf16.msra.mxu1 %v3563_v62  ;;  %v1015_v62 = vld [vmem:[#allocation2 + $0xc] sm:$0xf]  ;;  %v1109_v45 = vsel %vm4100_vm1, %v4068_v14, %v1108_v37  ;;  %v1020_v37 = vld [vmem:[#allocation2 + $0x20] sm:$0xf] }
  0x46   : > { %3342 = vmatprep.subr.bf16.mxu1 %v3565_v20  ;;  %v1069_v54 = vrot.slane %v1067_v39, 7  ;;  %v1090_v10 = vor.u32 %v1088_v47, %v1087_v1  ;;  %v1428_v47 = vshll.u32 %v4027_v27, 16  ;;  %vm4163_vm11 = vcmp.ne.s16.totalorder %v1109_v45, 0 }
  0x47   : > { %v2964_v27 = vcombine.low %v4035_v28, %v4035_v28 }
  0x48   : > { %3327 = vmatpush3.bf16.msra.mxu0 %v3574_v11  ;;  %v1072_v0 = vor.u32 %v1070_v43, %v1069_v54  ;;  %v1074_v49 = vrot.slane %v1069_v54, 4  ;;  %3311 = vmatmul.mubr.bf16.gmra.mxu1 %v896_v23  ;;  %v1092_v11 = vrot.slane %v1087_v1, 4  ;;  %v1091_v24 = vsel %vm4100_vm1, %v4068_v14, %v1090_v10 }
  0x49   : > { %3328 = vmatprep.subr.bf16.mxu0 %v3576_v63  ;;  %3343 = vmatpush3.bf16.msra.mxu1 %v3565_v20  ;;  %v1018_v20 = vld [vmem:[#allocation2 + $0x18] sm:$0xf]  ;;  %vm4140_vm9 = vcmp.ne.s16.totalorder %v1091_v24, 0  ;;  %v4153_v43 = vor.u32 %v1421_v18, %v1418_v60  ;;  %v1143_v23 = vsel %vm4163_vm11, %v1019_v26, 0  ;;  %v1430_v40 = vrot.slane %v1428_v47, 4 }
  0x4a   : > { %3344 = vmatprep.subr.bf16.mxu1 %v3567_v44  ;;  %v1073_v19 = vsel %vm4100_vm1, %v4068_v14, %v1072_v0  ;;  %v4120_v17 = vsel %vm4100_vm1, %v1074_v49, %v4023_v56  ;;  %v4134_v29 = vsel %vm4100_vm1, %v1092_v11, %v4023_v56  ;;  %v1141_v38 = vsel %vm4140_vm9, %v1017_v50, 0  ;;  %v3577_v50 = vld [vmem:[%s4498_s2 + $0xc0] sm:$0xff]  }
  0x4b   : > { %vm4126_vm4 = vcmp.ne.s16.totalorder %v1073_v19, 0  ;;  %vm1131_vm8 = vcmp.ne.s16.totalorder %v4120_v17, 0  ;;  %vm1133_vm10 = vcmp.ne.s16.totalorder %v4134_v29, 0  ;;  %v1423_v2 = vsel %vm852_vm13, %v1414_v21, %v4153_v43 }
  0x4c   : > { %3329 = vmatpush3.bf16.msra.mxu0 %v3576_v63  ;;  %v1139_v32 = vsel %vm4126_vm4, %v1015_v62, 0  ;;  %v1140_v35 = vsel %vm1131_vm8, %v1016_v34, 0  ;;  %v1142_v46 = vsel %vm1133_vm10, %v1018_v20, 0  ;;  %3354 = vmatprep.mubr.bf16.mxu1 %v1423_v2  ;;  %v3575_v62 = vld [vmem:[%s4498_s2 + $0xc8] sm:$0xff]   ;;  %v405_v0 = vadd.s32 56, %v3764_v8 }
  0x4d   : > { %3362 = vmatprep.subr.bf16.mxu0 %v4107_v9  ;;  %3345 = vmatpush3.bf16.msra.mxu1 %v3567_v44  ;;  %v2931_v39 = vcombine.low %v4076_v7, %v1139_v32  ;;  %v2932_v44 = vcombine.low %v1140_v35, %v1141_v38  ;;  %v4176_v1 = vcombine.low %v1142_v46, %v1143_v23  ;;  %v1365_v10 = vsel %vm4049_vm6, %v4161_v48, 0  ;;  %v3579_v32 = vld [vmem:[%s4498_s2 + $0x178] sm:$0xff]   ;;  %v3581_v23 = vld [vmem:[%s4498_s2 + $0x170] sm:$0xff]  }
  0x4e   : > { %3346 = vmatprep.subr.bf16.mxu1 %v3569_v3  ;;  %v459_v18 = vand.u32 15, %v405_v0  ;;  %v1443_v21 = vshrl.u32 %v2964_v27, 16  ;;  %v2963_v24 = vcombine.low %v1364_v6, %v1365_v10  ;;  %v1446_v26 = vshll.u32 %v2964_v27, 16  ;;  %v3582_v6 = vld [vmem:[%s4498_s2 + $0x128] sm:$0xff]   ;;  %v1021_v27 = vld [vmem:[#allocation2 + $0x24] sm:$0xf] }
  0x4f   : > { %v1189_v54 = vshrl.u32 %v2931_v39, 16  ;;  %v1191_v58 = vshll.u32 %v2931_v39, 16  ;;  %v1196_v60 = vshll.u32 %v2932_v44, 16  ;;  %v1200_v61 = vshrl.u32 %v2932_v44, 16  ;;  %v3622_v7 = vld [vmem:[#allocation2 + $0x18] sm:$0xf] }
  0x50   : > { %v1204_v11 = vshll.u32 %v4176_v1, 16  ;;  %vm517_vm12 = vcmp.ne.s32.totalorder %v459_v18, 15  ;;  %v1431_v35 = vor.u32 %v1430_v40, %v1427_v4  ;;  %v1434_v45 = vshrl.u32 %v2963_v24, 16  ;;  %v1739_v40 = vld [vmem:[#allocation2 + $0x14] sm:$0xf]  ;;  %v3584_v18 = vld [vmem:[%s4498_s2 + $0x120] sm:$0xff]  }
  0x51   : > { %3347 = vmatpush3.bf16.msra.mxu1 %v3569_v3  ;;  %v1193_v34 = vrot.slane %v1191_v58, 1  ;;  %v1198_v49 = vrot.slane %v1196_v60, 1  ;;  %v1110_v3 = vrot.slane %v4112_v15, 4  ;;  %v3580_v15 = vld [vmem:[%s4498_s2 + $0x130] sm:$0xff]   ;;  %vm1046_vm14 = vmpackc.low %vm517_vm12, %vm517_vm12  ;;  %v1437_v46 = vshll.u32 %v2963_v24, 16 }
  0x52   : > { %3348 = vmatprep.subr.bf16.mxu1 %v3573_v16  ;;  %v4188_v20 = vrot.slane %v1204_v11, 1  ;;  %v1054_v38 = vsel %vm1046_vm14, 65537, %v3668_v25  ;;  %v1445_v47 = vrot.slane %v1443_v21, 3  ;;  %v1022_v58 = vld [vmem:[#allocation2 + $0x28] sm:$0x1]  ;;  %v1436_v25 = vrot.slane %v1434_v45, 3 }
  0x53   : > { %v1194_v28 = vor.u32 %v1193_v34, %v1189_v54  ;;  %v1202_v19 = vor.u32 %v1200_v61, %v1198_v49  ;;  %v4196_v22 = vsel %vm4100_vm1, %v1110_v3, %v4023_v56  ;;  %v1121_v39 = vshrl.u32 %v1054_v38, 16  ;;  %v1740_v3 = vld [vmem:[#allocation2 + $0x18] sm:$0xf]  ;;  %v3602_v56 = vld [vmem:[%s4498_s2 + $0x1e8] sm:$0xff]  }
  0x54   : > { %v1124_v44 = vshll.u32 %v1054_v38, 16  ;;  %vm1135_vm15 = vcmp.ne.s16.totalorder %v4196_v22, 0  ;;  %v1439_v2 = vrot.slane %v1437_v46, 4  ;;  %v1448_v60 = vrot.slane %v1446_v26, 4 }
  0x55   : > { %3349 = vmatpush3.bf16.msra.mxu1 %v3573_v16  ;;  %v1199_v8 = vsel %vm1187_vm2, %v1194_v28, %v1198_v49  ;;  %v1207_v16 = vsel %vm1187_vm2, %v1202_v19, %v4188_v20  ;;  %v1123_v54 = vrot.slane %v1121_v39, 7  ;;  %v1432_v61 = vsel %vm852_vm13, %v4153_v43, %v1431_v35  ;;  %v1738_v49 = vld [vmem:[#allocation2 + $0x10] sm:$0xf]  ;;  %v1741_v43 = vld [vmem:[#allocation2 + $0x1c] sm:$0xf]  ;;  %v3611_v28 = vld [vmem:[%s4498_s2 + $0x180] sm:$0xff]  }
  0x56   : > { %3350 = vmatprep.subr.bf16.mxu1 %v3575_v62  ;;  %3330 = vmatprep.mubr.bf16.mxu0 %v1199_v8  ;;  %v1144_v34 = vsel %vm1135_vm15, %v1020_v37, 0  ;;  %v1440_v0 = vor.u32 %v1439_v2, %v1436_v25  ;;  %v1449_v11 = vor.u32 %v1448_v60, %v1445_v47  ;;  %v1747_v59 = vsel %vm1129_vm7, %v1738_v49, 0  ;;  %v4253_v37 = vld [vmem:[#allocation2 + $0x2c] sm:$0xf]  ;;  %v3585_v25 = vld [vmem:[%s4498_s2 + $0x160] sm:$0xff]  }
  0x57   : > { %3331 = vmatmul.mubr.bf16.vlgmr.msra.gmra.mxu0 %v1207_v16  ;;  %v1128_v4 = vrot.slane %v1123_v54, 4  ;;  %v1748_v19 = vsel %vm4126_vm4, %v1739_v40, 0  ;;  %v1749_v21 = vsel %vm1131_vm8, %v1740_v3, 0  ;;  %v1750_v24 = vsel %vm4140_vm9, %v1741_v43, 0  ;;  %v3583_v16 = vld [vmem:[%s4498_s2 + $0x168] sm:$0xff]  }
  0x58   : > { %3363 = vmatpush3.bf16.msra.mxu0 %v4107_v9  ;;  %v1126_v9 = vor.u32 %v1124_v44, %v1123_v54  ;;  %v3586_v44 = vld [vmem:[%s4498_s2 + $0x118] sm:$0xff]   ;;  %v1742_v49 = vld [vmem:[#allocation2 + $0x20] sm:$0xf]  ;;  %v1744_v40 = vld [vmem:[#allocation2 + $0x28] sm:$0xf] }
  0x59   : > { %3351 = vmatpush3.bf16.msra.mxu1 %v3575_v62  ;;  %3364 = vmatprep.subr.bf16.mxu0 %v3580_v15  ;;  %v1208_v62 = vshrl.u32 %v4176_v1, 16  ;;  %vm4224_vm0 = vcmp.ne.s16.totalorder %v1128_v4, 0  ;;  %v1441_v1 = vsel %vm852_vm13, %v1431_v35, %v1440_v0  ;;  %v3017_v35 = vcombine.low %v1747_v59, %v1748_v19  ;;  %v3587_v4 = vld [vmem:[%s4498_s2 + $0x158] sm:$0xff]   ;;  %v389_v3 = vld [vmem:[%s3793_s17 + $0x10] sm:$0xf] }
  0x5a   : > { %3352 = vmatprep.subr.bf16.mxu1 %v3577_v50  ;;  %v1127_v10 = vsel %vm4100_vm1, %v4068_v14, %v1126_v9  ;;  %v1146_v14 = vsel %vm4224_vm0, %v1022_v58, 0  ;;  %v4280_v43 = vld [vmem:[#allocation2 + $0x34] sm:$0xf]  ;;  %393 = vst [vmem:[#allocation2 + $0x30] sm:$0xf] %v389_v3  ;;  %v2016_v19 = vshrl.u32 %v3920_v30, 16 }
  0x5b   : > { %vm4232_vm12 = vcmp.ne.s16.totalorder %v1127_v10, 0  ;;  %v1210_v38 = vor.u32 %v1208_v62, %v4188_v20  ;;  %v1797_v47 = vshrl.u32 %v3017_v35, 16  ;;  %v1799_v54 = vshll.u32 %v3017_v35, 16 }
  0x5c   : > { %3365 = vmatpush3.bf16.msra.mxu0 %v3580_v15  ;;  %v1145_v8 = vsel %vm4232_vm12, %v1021_v27, 0  ;;  %v2935_v15 = vcombine.low %v1146_v14, %v1146_v14  ;;  %v1972_v62 = vsel %vm4014_vm5, %v4253_v37, 0  ;;  %v1751_v14 = vsel %vm1133_vm10, %v1742_v49, 0 }
  0x5d   : > { %3353 = vmatpush3.bf16.msra.mxu1 %v3577_v50  ;;  %3366 = vmatprep.subr.bf16.mxu0 %v3582_v6  ;;  %v2934_v26 = vcombine.low %v1144_v34, %v1145_v8  ;;  %v1801_v60 = vrot.slane %v1799_v54, 1  ;;  %v1753_v8 = vsel %vm1135_vm15, %v1744_v40, 0  ;;  %v2019_v35 = vshll.u32 %v3920_v30, 16  ;;  %v3604_v50 = vld [vmem:[%s4498_s2 + $0x1e0] sm:$0xff]  }
  0x5e   : > { %3386 = vmatprep.subr.bf16.mxu1 %v3579_v32  ;;  %v1220_v39 = vshll.u32 %v2935_v15, 16 }
  0x5f   : > { %v1212_v45 = vshll.u32 %v2934_v26, 16  ;;  %v1216_v46 = vshrl.u32 %v2934_v26, 16 }
  0x60   : > { %3355 = vmatmul.mubr.bf16.vlgmr.msra.gmra.mxu1 %v1432_v61  ;;  %3367 = vmatpush3.bf16.msra.mxu0 %v3582_v6  ;;  %v1222_v58 = vrot.slane %v1220_v39, 1  ;;  %v1450_v6 = vsel %vm852_vm13, %v1440_v0, %v1449_v11  ;;  %v3588_v61 = vld [vmem:[%s4498_s2 + $0x110] sm:$0xff]   ;;  %v1802_v0 = vor.u32 %v1801_v60, %v1797_v47  ;;  %v1745_v11 = vld [vmem:[#allocation2 + $0x2c] sm:$0xf]  ;;  %v2018_v47 = vrot.slane %v2016_v19, 3 }
  0x61   : > { %3387 = vmatpush3.bf16.msra.mxu1 %v3579_v32  ;;  %3358 = vmatprep.mubr.bf16.mxu1 %v1441_v1  ;;  %v4251_v32 = vcombine.low %v1749_v21, %v1750_v24  ;;  %v1214_v2 = vrot.slane %v1212_v45, 1  ;;  %v1754_v15 = vsel %vm4232_vm12, %v1745_v11, 0  ;;  %v1974_v21 = vsel %vm649_vm3, %v4280_v43, 0  ;;  %v3592_v24 = vld [vmem:[%s4498_s2 + $0x100] sm:$0xff]  }
  0x62   : > { %3388 = vmatprep.subr.bf16.mxu1 %v3581_v23  ;;  %3368 = vmatprep.subr.bf16.mxu0 %v3584_v18  ;;  %v4310_v39 = vcombine.low %v1753_v8, %v1754_v15  ;;  %v2024_v45 = vshrl.u32 %v3922_v33, 16  ;;  %v2990_v60 = vcombine.low %v3937_v53, %v3951_v57 }
  0x63   : > { %v1804_v20 = vshll.u32 %v4251_v32, 16  ;;  %v1215_v9 = vsel %vm1187_vm2, %v1210_v38, %v1214_v2  ;;  %v1218_v34 = vor.u32 %v1216_v46, %v1214_v2  ;;  %v1808_v38 = vshrl.u32 %v4251_v32, 16 }
  0x64   : > { %3369 = vmatpush3.bf16.msra.mxu0 %v3584_v18  ;;  %3334 = vmatprep.mubr.bf16.mxu0 %v1215_v9  ;;  %v3589_v18 = vld [vmem:[%s4498_s2 + $0x150] sm:$0xff]   ;;  %v3050_v32 = vcombine.low %v1974_v21, %v1974_v21  ;;  %v2036_v2 = vshll.u32 %v3994_v36, 16  ;;  %v2991_v9 = vcombine.low %v3971_v12, %v4018_v52  ;;  %v3596_v12 = vld [vmem:[%s4498_s2 + $0x1f8] sm:$0xff]   ;;  %v2992_v21 = vcombine.low %v4161_v48, %v3999_v42 }
  0x65   : > { %3389 = vmatpush3.bf16.msra.mxu1 %v3581_v23  ;;  %3370 = vmatprep.subr.bf16.mxu0 %v3586_v44  ;;  %v2989_v23 = vcombine.low %v3889_v13, %v3929_v41  ;;  %v1806_v27 = vrot.slane %v1804_v20, 1  ;;  %v3590_v13 = vld [vmem:[%s4498_s2 + $0x108] sm:$0xff]   ;;  %v1743_v41 = vld [vmem:[#allocation2 + $0x24] sm:$0xf]  ;;  %v1223_v10 = vsel %vm1187_vm2, %v1218_v34, %v1222_v58  ;;  %v2021_v58 = vrot.slane %v2019_v35, 4 }
  0x66   : > { %3390 = vmatprep.subr.bf16.mxu1 %v3583_v16  ;;  %3335 = vmatmul.mubr.bf16.gmra.mxu0 %v1223_v10  ;;  %v1752_v59 = vsel %vm4163_vm11, %v1743_v41, 0  ;;  %v2033_v20 = vshrl.u32 %v3994_v36, 16  ;;  %v1820_v34 = vshll.u32 %v4310_v39, 16  ;;  %v2038_v57 = vrot.slane %v2036_v2, 4  ;;  %v2347_v42 = vld [vmem:[#allocation2 + $0x1c] sm:$0xf] }
  0x67   : > { %v1807_v1 = vsel %vm1187_vm2, %v1802_v0, %v1806_v27  ;;  %3378 = vmatprep.mubr.bf16.mxu0 %v2989_v23  ;;  %v3019_v26 = vcombine.low %v1751_v14, %v1752_v59  ;;  %v1810_v23 = vor.u32 %v1808_v38, %v1806_v27  ;;  %v2022_v36 = vor.u32 %v2021_v58, %v2018_v47  ;;  %v3601_v14 = vld [vmem:[%s4498_s2 + $0x1a8] sm:$0xff]   ;;  %v2349_v47 = vld [vmem:[#allocation2 + $0x24] sm:$0xf] }
  0x68   : > { %3359 = vmatmul.mubr.bf16.gmra.mxu1 %v1450_v6  ;;  %3371 = vmatpush3.bf16.msra.mxu0 %v3586_v44  ;;  %v1746_v44 = vld [vmem:[#allocation2 + $0x30] sm:$0x1]  ;;  %v2026_v6 = vrot.slane %v2024_v45, 3  ;;  %v2035_v53 = vrot.slane %v2033_v20, 3  ;;  %v2051_v27 = vshrl.u32 %v3050_v32, 16  ;;  %v2054_v41 = vshll.u32 %v3050_v32, 16 }
  0x69   : > { %3391 = vmatpush3.bf16.msra.mxu1 %v3583_v16  ;;  %3372 = vmatprep.subr.bf16.mxu0 %v3588_v61  ;;  %v3591_v16 = vld [vmem:[%s4498_s2 + $0x148] sm:$0xff]   ;;  %v1755_v46 = vsel %vm4224_vm0, %v1746_v44, 0  ;;  %v1812_v30 = vshll.u32 %v3019_v26, 16  ;;  %v1816_v49 = vshrl.u32 %v3019_v26, 16  ;;  %v1822_v59 = vrot.slane %v1820_v34, 1  ;;  %v3598_v26 = vld [vmem:[%s4498_s2 + $0x1f0] sm:$0xff]  }
  0x6a   : > { %3392 = vmatprep.subr.bf16.mxu1 %v3585_v25  ;;  %3402 = vmatprep.mubr.bf16.mxu1 %v1807_v1  ;;  %v3021_v54 = vcombine.low %v1755_v46, %v1755_v46  ;;  %v2039_v3 = vor.u32 %v2038_v57, %v2035_v53  ;;  %v2053_v11 = vrot.slane %v2051_v27, 3  ;;  %v3603_v44 = vld [vmem:[%s4498_s2 + $0x1a0] sm:$0xff]   ;;  %v2346_v45 = vld [vmem:[#allocation2 + $0x18] sm:$0xf]  ;;  %v2350_v20 = vld [vmem:[#allocation2 + $0x28] sm:$0xf] }
  0x6b   : > { %v1814_v0 = vrot.slane %v1812_v30, 1  ;;  %v2348_v46 = vld [vmem:[#allocation2 + $0x20] sm:$0xf]  ;;  %v2355_v30 = vsel %vm1129_vm7, %v2346_v45, 0  ;;  %v2351_v2 = vld [vmem:[#allocation2 + $0x2c] sm:$0xf] }
  0x6c   : > { %3373 = vmatpush3.bf16.msra.mxu0 %v3588_v61  ;;  %v3593_v61 = vld [vmem:[%s4498_s2 + $0x140] sm:$0xff]   ;;  %v4334_v52 = vshll.u32 %v3021_v54, 16  ;;  %v2356_v54 = vsel %vm4126_vm4, %v2347_v42, 0  ;;  %v2357_v32 = vsel %vm1131_vm8, %v2348_v46, 0  ;;  %v3623_v27 = vld [vmem:[#allocation2 + $0x1c] sm:$0xf] }
  0x6d   : > { %3393 = vmatpush3.bf16.msra.mxu1 %v3585_v25  ;;  %3374 = vmatprep.subr.bf16.mxu0 %v3590_v13  ;;  %v2027_v25 = vshll.u32 %v3922_v33, 16  ;;  %v3597_v33 = vld [vmem:[%s4498_s2 + $0x1b0] sm:$0xff]   ;;  %v1818_v51 = vor.u32 %v1816_v49, %v1814_v0  ;;  %v3605_v49 = vld [vmem:[%s4498_s2 + $0x198] sm:$0xff]  }
  0x6e   : > { %3394 = vmatprep.subr.bf16.mxu1 %v3587_v4  ;;  %v3614_v46 = vld [vmem:[%s4498_s2 + $0x238] sm:$0xff]  }
  0x6f   : > { %v1823_v48 = vsel %vm1187_vm2, %v1818_v51, %v1822_v59 }
  0x70   : > { %3375 = vmatpush3.bf16.msra.mxu0 %v3590_v13  ;;  %v4329_v13 = vld [vmem:[#allocation2 + $0x30] sm:$0xf] }
  0x71   : > { %3395 = vmatpush3.bf16.msra.mxu1 %v3587_v4  ;;  %3376 = vmatprep.subr.bf16.mxu0 %v3592_v24  ;;  %v2029_v4 = vrot.slane %v2027_v25, 4  ;;  %v1973_v10 = vsel %vm4049_vm6, %v4329_v13, 0  ;;  %v3103_v25 = vcombine.low %v2355_v30, %v2356_v54  ;;  %v3615_v30 = vld [vmem:[%s4498_s2 + $0x230] sm:$0xff]   ;;  %v3624_v54 = vld [vmem:[#allocation2 + $0x20] sm:$0xf] }
  0x72   : > { %3396 = vmatprep.subr.bf16.mxu1 %v3589_v18  ;;  %v3049_v1 = vcombine.low %v1972_v62, %v1973_v10  ;;  %v1815_v62 = vsel %vm1187_vm2, %v1810_v23, %v1814_v0  ;;  %v2359_v23 = vsel %vm1133_vm10, %v2350_v20, 0  ;;  %v2362_v0 = vsel %vm4232_vm12, %v2353_v31, 0 }
  0x73   : > { %v2030_v40 = vor.u32 %v2029_v4, %v2026_v6  ;;  %v2358_v6 = vsel %vm4140_vm9, %v2349_v47, 0  ;;  %v2407_v34 = vshll.u32 %v3103_v25, 16  ;;  %v391_v4 = vld [vmem:[%s3793_s17 + $0x18] sm:$0xf]  ;;  %v3612_v47 = vld [vmem:[%s4498_s2 + $0x1c0] sm:$0xff]  }
  0x74   : > { %3377 = vmatpush3.bf16.msra.mxu0 %v3592_v24  ;;  %v2042_v8 = vshrl.u32 %v3049_v1, 16  ;;  %v2045_v15 = vshll.u32 %v3049_v1, 16  ;;  %v1824_v24 = vshrl.u32 %v4310_v39, 16  ;;  %v3104_v17 = vcombine.low %v2357_v32, %v2358_v6  ;;  %395 = vst [vmem:[#allocation2 + $0x38] sm:$0xf] %v391_v4  ;;  %v3616_v6 = vld [vmem:[%s4498_s2 + $0x228] sm:$0xff]  }
  0x75   : > { %3397 = vmatpush3.bf16.msra.mxu1 %v3589_v18  ;;  %3410 = vmatprep.subr.bf16.mxu0 %v3595_v55  ;;  %v2056_v18 = vrot.slane %v2054_v41, 4  ;;  %v2031_v19 = vsel %vm852_vm13, %v2022_v36, %v2030_v40  ;;  %v4348_v5 = vsel %vm852_vm13, %v2030_v40, %v2039_v3  ;;  %v3075_v41 = vcombine.low %v3622_v7, %v3623_v27 }
  0x76   : > { %3398 = vmatprep.subr.bf16.mxu1 %v3591_v16  ;;  %v2044_v35 = vrot.slane %v2042_v8, 3  ;;  %v2047_v38 = vrot.slane %v2045_v15, 4  ;;  %v1826_v58 = vor.u32 %v1824_v24, %v1822_v59  ;;  %v2412_v53 = vshll.u32 %v3104_v17, 16  ;;  %v3607_v59 = vld [vmem:[%s4498_s2 + $0x190] sm:$0xff]  }
  0x77   : > { %3379 = vmatmul.mubr.bf16.vlgmr.msra.gmra.mxu0 %v2990_v60  ;;  %v2416_v57 = vshrl.u32 %v3104_v17, 16  ;;  %v2409_v22 = vrot.slane %v2407_v34, 1 }
  0x78   : > { %3411 = vmatpush3.bf16.msra.mxu0 %v3595_v55  ;;  %3382 = vmatprep.mubr.bf16.mxu0 %v2991_v9  ;;  %v2057_v55 = vor.u32 %v2056_v18, %v2053_v11  ;;  %v2048_v39 = vor.u32 %v2047_v38, %v2044_v35  ;;  %v2405_v9 = vshrl.u32 %v3103_v25, 16  ;;  %v2414_v40 = vrot.slane %v2412_v53, 1  ;;  %v3609_v35 = vld [vmem:[%s4498_s2 + $0x188] sm:$0xff]  }
  0x79   : > { %3399 = vmatpush3.bf16.msra.mxu1 %v3591_v16  ;;  %3412 = vmatprep.subr.bf16.mxu0 %v3597_v33  ;;  %v1830_v16 = vrot.slane %v4334_v52, 1  ;;  %v3626_v25 = vld [vmem:[#allocation2 + $0x28] sm:$0xf] }
  0x7a   : > { %3400 = vmatprep.subr.bf16.mxu1 %v3593_v61  ;;  %v4374_v63 = vsel %vm852_vm13, %v2039_v3, %v2048_v39  ;;  %v4377_v60 = vsel %vm852_vm13, %v2048_v39, %v2057_v55  ;;  %v2410_v1 = vor.u32 %v2409_v22, %v2405_v9  ;;  %v2418_v18 = vor.u32 %v2416_v57, %v2414_v40  ;;  %v3608_v55 = vld [vmem:[%s4498_s2 + $0x1d0] sm:$0xff]  }
  0x7b   : > { %v1831_v52 = vsel %vm1187_vm2, %v1826_v58, %v1830_v16  ;;  %v2354_v24 = vld [vmem:[#allocation2 + $0x38] sm:$0x1]  ;;  %v3625_v58 = vld [vmem:[#allocation2 + $0x24] sm:$0xf]  ;;  %v3077_v20 = vcombine.low %v3626_v25, %v4253_v37 }
  0x7c   : > { %3413 = vmatpush3.bf16.msra.mxu0 %v3597_v33  ;;  %v2360_v33 = vsel %vm4163_vm11, %v2351_v2, 0  ;;  %v2363_v16 = vsel %vm4224_vm0, %v2354_v24, 0  ;;  %v3076_v32 = vcombine.low %v3624_v54, %v3625_v58  ;;  %v3078_v2 = vcombine.low %v4329_v13, %v4280_v43  ;;  %v3618_v37 = vld [vmem:[%s4498_s2 + $0x218] sm:$0xff]   ;;  %v3620_v43 = vld [vmem:[%s4498_s2 + $0x208] sm:$0xff]   ;;  %v3621_v13 = vld [vmem:[%s4498_s2 + $0x200] sm:$0xff]  }
  0x7d   : > { %3401 = vmatpush3.bf16.msra.mxu1 %v3593_v61  ;;  %3414 = vmatprep.subr.bf16.mxu0 %v3601_v14  ;;  %v2352_v61 = vld [vmem:[#allocation2 + $0x30] sm:$0xf]  ;;  %v3105_v29 = vcombine.low %v2359_v23, %v2360_v33  ;;  %v3107_v38 = vcombine.low %v2363_v16, %v2363_v16 }
  0x7e   : > { %3434 = vmatprep.subr.bf16.mxu1 %v3596_v12  ;;  %v2361_v36 = vsel %vm1135_vm15, %v2352_v61, 0 }
  0x7f   : > { %3383 = vmatmul.mubr.bf16.gmra.mxu0 %v2992_v21  ;;  %v2420_v3 = vshll.u32 %v3105_v29, 16  ;;  %v2424_v10 = vshrl.u32 %v3105_v29, 16  ;;  %v2436_v45 = vshll.u32 %v3107_v38, 16 }
  0x80   : > { %3403 = vmatmul.mubr.bf16.vlgmr.msra.gmra.mxu1 %v1815_v62  ;;  %3415 = vmatpush3.bf16.msra.mxu0 %v3601_v14  ;;  %v3606_v62 = vld [vmem:[%s4498_s2 + $0x1d8] sm:$0xff]  }
  0x81   : > { %3435 = vmatpush3.bf16.msra.mxu1 %v3596_v12  ;;  %3406 = vmatprep.mubr.bf16.mxu1 %v1823_v48  ;;  %v3106_v12 = vcombine.low %v2361_v36, %v2362_v0  ;;  %v2422_v14 = vrot.slane %v2420_v3, 1  ;;  %v2438_v42 = vrot.slane %v2436_v45, 1  ;;  %v3610_v48 = vld [vmem:[%s4498_s2 + $0x1c8] sm:$0xff]  }
  0x82   : > { %3436 = vmatprep.subr.bf16.mxu1 %v3598_v26  ;;  %3426 = vmatprep.mubr.bf16.mxu0 %v2031_v19  ;;  %v2415_v19 = vsel %vm1187_vm2, %v2410_v1, %v2414_v40 }
  0x83   : > { %3416 = vmatprep.subr.bf16.mxu0 %v3603_v44  ;;  %v2428_v11 = vshll.u32 %v3106_v12, 16  ;;  %v2426_v8 = vor.u32 %v2424_v10, %v2422_v14  ;;  %v4400_v15 = vsel %vm1187_vm2, %v2418_v18, %v2422_v14  ;;  %v2432_v21 = vshrl.u32 %v3106_v12, 16 }
  0x84   : > { %3417 = vmatpush3.bf16.msra.mxu0 %v3603_v44 }
  0x85   : > { %3437 = vmatpush3.bf16.msra.mxu1 %v3598_v26  ;;  %3418 = vmatprep.subr.bf16.mxu0 %v3605_v49  ;;  %v2430_v51 = vrot.slane %v2428_v11, 1 }
  0x86   : > { %3438 = vmatprep.subr.bf16.mxu1 %v3602_v56 }
  0x87   : > { %v2431_v26 = vsel %vm1187_vm2, %v2426_v8, %v2430_v51  ;;  %v2434_v44 = vor.u32 %v2432_v21, %v2430_v51 }
  0x88   : > { %3407 = vmatmul.mubr.bf16.gmra.mxu1 %v1831_v52  ;;  %3419 = vmatpush3.bf16.msra.mxu0 %v3605_v49 }
  0x89   : > { %3439 = vmatpush3.bf16.msra.mxu1 %v3602_v56  ;;  %3450 = vmatprep.mubr.bf16.mxu1 %v3075_v41  ;;  %v4421_v39 = vsel %vm1187_vm2, %v2434_v44, %v2438_v42  ;;  %v3619_v56 = vld [vmem:[%s4498_s2 + $0x210] sm:$0xff]  }
  0x8a   : > { %3440 = vmatprep.subr.bf16.mxu1 %v3604_v50  ;;  %3420 = vmatprep.subr.bf16.mxu0 %v3607_v59 }
  0x8c   : > { %3421 = vmatpush3.bf16.msra.mxu0 %v3607_v59 }
  0x8d   : > { %3441 = vmatpush3.bf16.msra.mxu1 %v3604_v50  ;;  %3422 = vmatprep.subr.bf16.mxu0 %v3609_v35 }
  0x8e   : > { %3442 = vmatprep.subr.bf16.mxu1 %v3606_v62 }
  0x90   : > { %3423 = vmatpush3.bf16.msra.mxu0 %v3609_v35 }
  0x91   : > { %3443 = vmatpush3.bf16.msra.mxu1 %v3606_v62  ;;  %3424 = vmatprep.subr.bf16.mxu0 %v3611_v28 }
  0x92   : > { %3444 = vmatprep.subr.bf16.mxu1 %v3608_v55 }
  0x94   : > { %3425 = vmatpush3.bf16.msra.mxu0 %v3611_v28 }
  0x95   : > { %3445 = vmatpush3.bf16.msra.mxu1 %v3608_v55  ;;  %3458 = vmatprep.subr.bf16.mxu0 %v3614_v46 }
  0x96   : > { %3446 = vmatprep.subr.bf16.mxu1 %v3610_v48 }
  0x97   : > { %3427 = vmatmul.mubr.bf16.vlgmr.msra.gmra.mxu0 %v4348_v5  ;;  %v3617_v5 = vld [vmem:[%s4498_s2 + $0x220] sm:$0xff]  }
  0x98   : > { %3459 = vmatpush3.bf16.msra.mxu0 %v3614_v46  ;;  %3430 = vmatprep.mubr.bf16.mxu0 %v4374_v63 }
  0x99   : > { %3447 = vmatpush3.bf16.msra.mxu1 %v3610_v48  ;;  %3460 = vmatprep.subr.bf16.mxu0 %v3615_v30 }
  0x9a   : > { %3448 = vmatprep.subr.bf16.mxu1 %v3612_v47 }
  0x9c   : > { %3461 = vmatpush3.bf16.msra.mxu0 %v3615_v30 }
  0x9d   : > { %3449 = vmatpush3.bf16.msra.mxu1 %v3612_v47  ;;  %3462 = vmatprep.subr.bf16.mxu0 %v3616_v6 }
  0x9e   : > { %3482 = vmatprep.subr.bf16.mxu1 %v3614_v46 }
  0x9f   : > { %3431 = vmatmul.mubr.bf16.gmra.mxu0 %v4377_v60 }
  0xa0   : > { %3451 = vmatmul.mubr.bf16.vlgmr.msra.gmra.mxu1 %v3076_v32  ;;  %3463 = vmatpush3.bf16.msra.mxu0 %v3616_v6 }
  0xa1   : > { %3490 = vmatpush3.bf16.msra.mxu1 %v3614_v46  ;;  %3454 = vmatprep.mubr.bf16.mxu1 %v3077_v20 }
  0xa2   : > { %3483 = vmatprep.subr.bf16.mxu1 %v3615_v30  ;;  %3474 = vmatprep.mubr.bf16.mxu0 %v2415_v19 }
  0xa3   : > { %3464 = vmatprep.subr.bf16.mxu0 %v3617_v5 }
  0xa4   : > { %3465 = vmatpush3.bf16.msra.mxu0 %v3617_v5 }
  0xa5   : > { %3491 = vmatpush3.bf16.msra.mxu1 %v3615_v30  ;;  %3466 = vmatprep.subr.bf16.mxu0 %v3618_v37 }
  0xa6   : > { %3484 = vmatprep.subr.bf16.mxu1 %v3616_v6 }
  0xa8   : > { %3455 = vmatmul.mubr.bf16.gmra.mxu1 %v3078_v2  ;;  %3467 = vmatpush3.bf16.msra.mxu0 %v3618_v37 }
  0xa9   : > { %3492 = vmatpush3.bf16.msra.mxu1 %v3616_v6  ;;  %3478 = vmatprep.mubr.bf16.mxu1 %v2431_v26 }
  0xaa   : > { %3485 = vmatprep.subr.bf16.mxu1 %v3617_v5  ;;  %3468 = vmatprep.subr.bf16.mxu0 %v3619_v56 }
  0xac   : > { %3469 = vmatpush3.bf16.msra.mxu0 %v3619_v56 }
  0xad   : > { %3493 = vmatpush3.bf16.msra.mxu1 %v3617_v5  ;;  %3470 = vmatprep.subr.bf16.mxu0 %v3620_v43 }
  0xae   : > { %3486 = vmatprep.subr.bf16.mxu1 %v3618_v37 }
  0xb0   : > { %3471 = vmatpush3.bf16.msra.mxu0 %v3620_v43 }
  0xb1   : > { %3494 = vmatpush3.bf16.msra.mxu1 %v3618_v37  ;;  %3472 = vmatprep.subr.bf16.mxu0 %v3621_v13 }
  0xb2   : > { %3487 = vmatprep.subr.bf16.mxu1 %v3619_v56 }
  0xb4   : > { %3473 = vmatpush3.bf16.msra.mxu0 %v3621_v13 }
  0xb5   : > { %3495 = vmatpush3.bf16.msra.mxu1 %v3619_v56 }
  0xb6   : > { %3488 = vmatprep.subr.bf16.mxu1 %v3620_v43 }
  0xb7   : > { %3475 = vmatmul.mubr.bf16.vlgmr.msra.gmra.mxu0 %v4400_v15 }
  0xb9   : > { %3496 = vmatpush3.bf16.msra.mxu1 %v3620_v43 }
  0xba   : > { %3489 = vmatprep.subr.bf16.mxu1 %v3621_v13 }
  0xbd   : > { %3497 = vmatpush3.bf16.msra.mxu1 %v3621_v13 }
  0xc0   : > { %3479 = vmatmul.mubr.bf16.vlgmr.msra.gmra.mxu1 %v4421_v39 }
  0xef   : > { %v3284_v63 = vpop.f32.mrf.mxu0 }
  0xf1   : > { %v798_v60 = vpop.f32.mrf.mxu0 }
  0xf3   : > { %v3285_v61 = vpop.f32.mrf.mxu0 }
  0xf5   : > { %v801_v23 = vpop.f32.mrf.mxu0 }
  0xf7   : > { %v3288_v34 = vpop.f32.mrf.mxu0 }
  0xf9   : > { %v814_v36 = vpop.f32.mrf.mxu0 }
  0xfb   : > { %v3289_v53 = vpop.f32.mrf.mxu0 }
  0xfd   : > { %v817_v0 = vpop.f32.mrf.mxu0 }
 0x100   : > { %v3308_v17 = vpop.f32.mrf.mxu1 }
 0x101   : > { %v992_v32 = vadd.f32 %v3308_v17, %v3284_v63 }
 0x102   : > { %v983_v31 = vpop.f32.mrf.mxu1 }
 0x103   : > { %v984_v25 = vadd.f32 %v983_v31, %v798_v60 }
 0x104   : > { %v3309_v9 = vpop.f32.mrf.mxu1 }
 0x105   : > { %v995_v20 = vadd.f32 %v3309_v9, %v3285_v61 }
 0x106   : > { %v986_v33 = vpop.f32.mrf.mxu1 }
 0x107   : > { %v987_v37 = vadd.f32 %v986_v33, %v801_v23 }
 0x108   : > { %v3312_v4 = vpop.f32.mrf.mxu1 }
 0x10a   : > { %v999_v57 = vpop.f32.mrf.mxu1 }
 0x10b   : > { %v1000_v31 = vadd.f32 %v999_v57, %v814_v36 }
 0x10c   : > { %v3313_v29 = vpop.f32.mrf.mxu1 }
 0x10d   : > { %v1011_v60 = vadd.f32 %v3313_v29, %v3289_v53 }
 0x10e   : > { %v1002_v7 = vpop.f32.mrf.mxu1 }
 0x10f   : > { %v1003_v33 = vadd.f32 %v1002_v7, %v817_v0 }
 0x117   : > { %v3332_v49 = vpop.f32.mrf.mxu0 }
 0x118   : > { %v1343_v5 = vadd.f32 %v3332_v49, %v992_v32 }
 0x119   : > { %v1310_v27 = vpop.f32.mrf.mxu0 }
 0x11a   : > { %v1341_v56 = vadd.f32 %v1310_v27, %v984_v25 }
 0x11b   : > { %v3333_v22 = vpop.f32.mrf.mxu0 }
 0x11c   : > { %v1344_v43 = vadd.f32 %v3333_v22, %v995_v20 }
 0x11d   : > { %v1313_v52 = vpop.f32.mrf.mxu0 }
 0x11e   : > { %v1342_v63 = vadd.f32 %v1313_v52, %v987_v37 }
 0x120   : > { %v3356_v41 = vpop.f32.mrf.mxu1 }
 0x121   : > { %v1570_v17 = vadd.f32 %v3356_v41, %v1343_v5 }
 0x122   : > { %v1537_v12 = vpop.f32.mrf.mxu1 }
 0x123   : > { %v1568_v61 = vadd.f32 %v1537_v12, %v1341_v56 }
 0x124   : > { %v3357_v40 = vpop.f32.mrf.mxu1 }
 0x125   : > { %v1571_v32 = vadd.f32 %v3357_v40, %v1344_v43 }
 0x126   : > { %v3336_v3 = vpop.f32.mrf.mxu0  ;;  %v1540_v10 = vpop.f32.mrf.mxu1 }
 0x127   : > { %v1569_v22 = vadd.f32 %v1540_v10, %v1342_v63 }
 0x128   : > { %v1326_v50 = vpop.f32.mrf.mxu0  ;;  %v3360_v1 = vpop.f32.mrf.mxu1 }
 0x129   : > { %v1345_v25 = vadd.f32 %v1326_v50, %v1000_v31 }
 0x12a   : > { %v3337_v11 = vpop.f32.mrf.mxu0  ;;  %v1553_v18 = vpop.f32.mrf.mxu1 }
 0x12b   : > { %v1348_v27 = vadd.f32 %v3337_v11, %v1011_v60  ;;  %v1572_v57 = vadd.f32 %v1553_v18, %v1345_v25 }
 0x12c   : > { %v1329_v14 = vpop.f32.mrf.mxu0  ;;  %v3361_v59 = vpop.f32.mrf.mxu1 }
 0x12d   : > { %v1346_v5 = vadd.f32 %v1329_v14, %v1003_v33  ;;  %v1575_v29 = vadd.f32 %v3361_v59, %v1348_v27 }
 0x12e   : > { %v1556_v51 = vpop.f32.mrf.mxu1 }
 0x137   : > { %v3380_v19 = vpop.f32.mrf.mxu0 }
 0x138   : > { %v1732_v23 = vadd.f32 %v3380_v19, %v1570_v17  ;;  %v1573_v19 = vadd.f32 %v1556_v51, %v1346_v5 }
 0x139   : > { %v1699_v8 = vpop.f32.mrf.mxu0 }
 0x13b   : > { %v3381_v62 = vpop.f32.mrf.mxu0 }
 0x13d   : > { %v1702_v24 = vpop.f32.mrf.mxu0 }
 0x13e   : > { %v1731_v36 = vadd.f32 %v1702_v24, %v1569_v22 }
 0x13f   : > { %v3384_v16 = vpop.f32.mrf.mxu0 }
 0x140   : > { %v3404_v15 = vpop.f32.mrf.mxu1 }
 0x141   : > { %v1715_v38 = vpop.f32.mrf.mxu0  ;;  %v1951_v52 = vadd.f32 %v3404_v15, %v1732_v23 }
 0x142   : > { %v1918_v21 = vpop.f32.mrf.mxu1  ;;  %v1734_v0 = vadd.f32 %v1715_v38, %v1572_v57 }
 0x143   : > { %v3385_v44 = vpop.f32.mrf.mxu0 }
 0x144   : > { %v3405_v26 = vpop.f32.mrf.mxu1  ;;  %v1737_v7 = vadd.f32 %v3385_v44, %v1575_v29 }
 0x145   : > { %v1718_v28 = vpop.f32.mrf.mxu0 }
 0x146   : > { %v1921_v35 = vpop.f32.mrf.mxu1 }
 0x147   : > { %v1950_v11 = vadd.f32 %v1921_v35, %v1731_v36 }
 0x148   : > { %v3408_v55 = vpop.f32.mrf.mxu1 }
 0x14a   : > { %v1934_v45 = vpop.f32.mrf.mxu1 }
 0x14b   : > { %v1953_v18 = vadd.f32 %v1934_v45, %v1734_v0 }
 0x14c   : > { %v3409_v42 = vpop.f32.mrf.mxu1 }
 0x14d   : > { %v1956_v59 = vadd.f32 %v3409_v42, %v1737_v7 }
 0x14e   : > { %v4458_v39 = vpop.f32.mrf.mxu1 }
 0x14f   : > { %4537 = vst [vmem:[#allocation3_spill] sm:$0xff] %v4458_v39  ;;  %v1008_v39 = vadd.f32 %v3312_v4, %v3288_v34  ;;  %v1730_v4 = vadd.f32 %v1699_v8, %v1568_v61  ;;  %v1733_v34 = vadd.f32 %v3381_v62, %v1571_v32  ;;  %v1735_v62 = vadd.f32 %v1718_v28, %v1573_v19  ;;  %v3116_v28 = vld [vmem:[%s4499_s3] ss:$0 sm:$0xff] }
 0x151   : > { %v1347_v49 = vadd.f32 %v3336_v3, %v1008_v39  ;;  %v1949_v12 = vadd.f32 %v1918_v21, %v1730_v4  ;;  %v1952_v56 = vadd.f32 %v3405_v26, %v1733_v34 }
 0x153   : > { %v1574_v37 = vadd.f32 %v3360_v1, %v1347_v49 }
 0x155   : > { %v1736_v40 = vadd.f32 %v3384_v16, %v1574_v37 }
 0x156   : > { %v4538_v51 = vld [vmem:[#allocation3_spill] sm:$0xff] }
 0x157   : > { %v3428_v48 = vpop.f32.mrf.mxu0  ;;  %v1955_v1 = vadd.f32 %v3408_v55, %v1736_v40  ;;  %v1954_v38 = vadd.f32 %v4538_v51, %v1735_v62 }
 0x158   : > { %v2178_v3 = vadd.f32 %v3428_v48, %v1951_v52 }
 0x159   : > { %v2145_v46 = vpop.f32.mrf.mxu0 }
 0x15a   : > { %v2176_v10 = vadd.f32 %v2145_v46, %v1949_v12 }
 0x15b   : > { %v3429_v30 = vpop.f32.mrf.mxu0 }
 0x15c   : > { %v2179_v8 = vadd.f32 %v3429_v30, %v1952_v56 }
 0x15d   : > { %v2148_v58 = vpop.f32.mrf.mxu0 }
 0x15e   : > { %v2177_v24 = vadd.f32 %v2148_v58, %v1950_v11 }
 0x15f   : > { %v3432_v2 = vpop.f32.mrf.mxu0 }
 0x160   : > { %v3452_v47 = vpop.f32.mrf.mxu1  ;;  %v2182_v16 = vadd.f32 %v3432_v2, %v1955_v1 }
 0x161   : > { %v2161_v9 = vpop.f32.mrf.mxu0  ;;  %v2340_v15 = vadd.f32 %v3452_v47, %v2178_v3 }
 0x162   : > { %v2307_v54 = vpop.f32.mrf.mxu1  ;;  %v2180_v44 = vadd.f32 %v2161_v9, %v1953_v18 }
 0x163   : > { %v3433_v41 = vpop.f32.mrf.mxu0  ;;  %v2338_v21 = vadd.f32 %v2307_v54, %v2176_v10 }
 0x164   : > { %v3453_v6 = vpop.f32.mrf.mxu1  ;;  %v2183_v17 = vadd.f32 %v3433_v41, %v1956_v59 }
 0x165   : > { %v2164_v50 = vpop.f32.mrf.mxu0  ;;  %v2341_v26 = vadd.f32 %v3453_v6, %v2179_v8 }
 0x166   : > { %v2310_v13 = vpop.f32.mrf.mxu1  ;;  %v2181_v42 = vadd.f32 %v2164_v50, %v1954_v38 }
 0x167   : > { %v2339_v46 = vadd.f32 %v2310_v13, %v2177_v24 }
 0x168   : > { %v3456_v20 = vpop.f32.mrf.mxu1 }
 0x169   : > { %v2344_v58 = vadd.f32 %v3456_v20, %v2182_v16 }
 0x16a   : > { %v2323_v53 = vpop.f32.mrf.mxu1 }
 0x16b   : > { %v2342_v31 = vadd.f32 %v2323_v53, %v2180_v44 }
 0x16c   : > { %v3457_v14 = vpop.f32.mrf.mxu1 }
 0x16d   : > { %v2345_v60 = vadd.f32 %v3457_v14, %v2183_v17 }
 0x16e   : > { %v2326_v35 = vpop.f32.mrf.mxu1 }
 0x16f   : > { %v2343_v23 = vadd.f32 %v2326_v35, %v2181_v42 }
 0x177   : > { %v3476_v39 = vpop.f32.mrf.mxu0 }
 0x178   : > { %v2559_v48 = vadd.f32 %v3476_v39, %v2340_v15 }
 0x179   : > { %v2526_v43 = vpop.f32.mrf.mxu0 }
 0x17a   : > { %v2557_v47 = vadd.f32 %v2526_v43, %v2338_v21  ;;  %v2574_v6 = vadd.f32 %v3116_v28, %v2559_v48 }
 0x17b   : > { %v3477_v55 = vpop.f32.mrf.mxu0 }
 0x17c   : > { %v2560_v45 = vadd.f32 %v3477_v55, %v2341_v26  ;;  %v2572_v32 = vadd.f32 %v3116_v28, %v2557_v47 }
 0x17d   : > { %v2529_v54 = vpop.f32.mrf.mxu0 }
 0x17e   : > { %v2575_v2 = vadd.f32 %v3116_v28, %v2560_v45  ;;  %v2558_v63 = vadd.f32 %v2529_v54, %v2339_v46 }
 0x180   : > { %v3480_v30 = vpop.f32.mrf.mxu1  ;;  %v3143_v13 = vpack.c.bf16 %v2575_v2, %v2574_v6  ;;  %v2573_v49 = vadd.f32 %v3116_v28, %v2558_v63 }
 0x181   : > { %v2563_v61 = vadd.f32 %v3480_v30, %v2344_v58 }
 0x182   : > { %v2542_v9 = vpop.f32.mrf.mxu1  ;;  %3155 = vst [vmem:[%s346_s20 + $0x8] sm:$0xff] %v3143_v13   ;;  %v3138_v20 = vpack.c.bf16 %v2573_v49, %v2572_v32  ;;  %v2620_v22 = vadd.f32 %v2573_v49, %v2572_v32 }
 0x183   : > { %v2561_v25 = vadd.f32 %v2542_v9, %v2342_v31  ;;  %v2578_v34 = vadd.f32 %v3116_v28, %v2563_v61 }
 0x184   : > { %v3481_v33 = vpop.f32.mrf.mxu1  ;;  %3139 = vst [vmem:[%s346_s20] sm:$0xff] %v3138_v20   ;;  %v2621_v41 = vadd.f32 %v2620_v22, %v2574_v6 }
 0x185   : > { %v2564_v27 = vadd.f32 %v3481_v33, %v2345_v60  ;;  %v2576_v52 = vadd.f32 %v3116_v28, %v2561_v25 }
 0x186   : > { %v2545_v4 = vpop.f32.mrf.mxu1  ;;  %v2622_v29 = vadd.f32 %v2621_v41, %v2575_v2 }
 0x187   : > { %v2579_v5 = vadd.f32 %v3116_v28, %v2564_v27  ;;  %v2562_v37 = vadd.f32 %v2545_v4, %v2343_v23 }
 0x188   : > { %v2623_v12 = vadd.f32 %v2622_v29, %v2576_v52 }
 0x189   : > { %v3153_v36 = vpack.c.bf16 %v2579_v5, %v2578_v34  ;;  %v2577_v57 = vadd.f32 %v3116_v28, %v2562_v37 }
 0x18b   : > { %3157 = vst [vmem:[%s346_s20 + $0x18] sm:$0xff] %v3153_v36   ;;  %v3148_v53 = vpack.c.bf16 %v2577_v57, %v2576_v52  ;;  %v2624_v56 = vadd.f32 %v2623_v12, %v2577_v57 }
 0x18d   : > { %3156 = vst [vmem:[%s346_s20 + $0x10] sm:$0xff] %v3148_v53   ;;  %v2625_v40 = vadd.f32 %v2624_v56, %v2578_v34 }
 0x18f   : > { %v2626_v3 = vadd.f32 %v2625_v40, %v2579_v5 }
 0x191   : > { %v2627_v19 = vrot.slane %v2626_v3, 4 }
 0x193   : > { %v2628_v0 = vadd.f32 %v2627_v19, %v2626_v3 }
 0x195   : > { %v2629_v7 = vrot.slane %v2628_v0, 2 }
 0x197   : > { %v2630_v50 = vadd.f32 %v2629_v7, %v2628_v0 }
 0x199   : > { %v2631_v11 = vrot.slane %v2630_v50, 1 }
 0x19b   : > { %v2632_v10 = vadd.f32 %v2631_v11, %v2630_v50 }
 0x19d   : > { %v2633_v8 = vmul.f32 0.015625, %v2632_v10  ;;  %2642 = vst [vmem:[%s354_s7] sm:$0x1] %v2632_v10 }
 0x19f   : > { %v2634_v62 = vsub.f32 %v2572_v32, %v2633_v8  ;;  %v2635_v14 = vsub.f32 %v2573_v49, %v2633_v8  ;;  %v2636_v39 = vsub.f32 %v2574_v6, %v2633_v8  ;;  %v2637_v1 = vsub.f32 %v2575_v2, %v2633_v8 }
 0x1a0   : > { %v2638_v18 = vsub.f32 %v2576_v52, %v2633_v8  ;;  %v2639_v21 = vsub.f32 %v2577_v57, %v2633_v8  ;;  %v2640_v48 = vsub.f32 %v2578_v34, %v2633_v8  ;;  %v2641_v44 = vsub.f32 %v2579_v5, %v2633_v8 }
 0x1a1   : > { %v2643_v15 = vmul.f32 %v2634_v62, %v2634_v62  ;;  %v2644_v24 = vmul.f32 %v2635_v14, %v2635_v14  ;;  %v2645_v59 = vmul.f32 %v2636_v39, %v2636_v39  ;;  %v2646_v26 = vmul.f32 %v2637_v1, %v2637_v1 }
 0x1a2   : > { %v2647_v51 = vmul.f32 %v2638_v18, %v2638_v18  ;;  %v2648_v17 = vmul.f32 %v2639_v21, %v2639_v21  ;;  %v2649_v28 = vmul.f32 %v2640_v48, %v2640_v48  ;;  %v2650_v46 = vmul.f32 %v2641_v44, %v2641_v44 }
 0x1a3   : > { %v2651_v43 = vadd.f32 %v2644_v24, %v2643_v15 }
 0x1a5   : > { %v2652_v16 = vadd.f32 %v2651_v43, %v2645_v59 }
 0x1a7   : > { %v2653_v38 = vadd.f32 %v2652_v16, %v2646_v26 }
 0x1a9   : > { %v2654_v35 = vadd.f32 %v2653_v38, %v2647_v51 }
 0x1ab   : > { %v2655_v55 = vadd.f32 %v2654_v35, %v2648_v17 }
 0x1ad   : > { %v2656_v47 = vadd.f32 %v2655_v55, %v2649_v28 }
 0x1af   : > { %v2657_v45 = vadd.f32 %v2656_v47, %v2650_v46 }
 0x1b1   : > { %v2658_v42 = vrot.slane %v2657_v45, 4 }
 0x1b3   : > { %v2659_v30 = vadd.f32 %v2658_v42, %v2657_v45 }
 0x1b5   : > { %v2660_v54 = vrot.slane %v2659_v30, 2 }
 0x1b7   : > { %v2661_v58 = vadd.f32 %v2660_v54, %v2659_v30 }
 0x1b9   : > { %v2662_v6 = vrot.slane %v2661_v58, 1 }
 0x1bb   : > { %v2663_v2 = vadd.f32 %v2662_v6, %v2661_v58 }
 0x1bd   : > { %2664 = vst [vmem:[%s361_s8] sm:$0x1] %v2663_v2 }
 0x1be PF: > { %s17_s25 = sadd.s32 1, %s3665_s25   ;;  %s4539_s21 = smov %s3657_s23 }
 0x1bf   : > { %p14_p8 = scmp.ge.s32.totalorder %s17_s25, 10   ;;  %s4540_s22 = smov %s3661_s24 }
 0x1c0   : > { %s4541_s23 = smov %s4544_s26  ;;  %s4542_s24 = smov %s4548_s27 }
 0x1c1   :  { %16 = sbr.rel (!%p14_p8) target bundleno = 3 (0x3), region = 101 }

// kernel: basic_conv_block.8
= control target key start
LH: loop header
LB: loop body
LE: loop exit
PB: predicated region body
PF: predicated region fallthrough
CT: control target
= control target key end

     0   :  { %s485_s12 = smov 0   ;;  %s487_s13 = smov 0   ;;  %s551_s0 = inlined_call_operand.vmem [shape: bf16[2,256,128], index: 0, kind: input, shape index: {}]   ;;  %s552_s1 = inlined_call_operand.vmem [shape: f32[1,128], index: 1, kind: input, shape index: {}]   ;;  %s553_s2 = inlined_call_operand.vmem [shape: f32[1,128], index: 2, kind: input, shape index: {}]   ;;  %s554_s3 = inlined_call_operand.vmem [shape: f32[2,4,1,128], index: 3, kind: output, shape index: {}]  }
   0x1   :  { %s489_s14 = smov 0   ;;  %s491_s15 = smov 0  }
   0x2   :  { %s493_s16 = smov 0  }
   0x3 LB: > { %s22_s17 = sadd.s32 1, %s455_s14  ;;  %s25_s18 = sadd.s32 1, %s459_s15  ;;  %s463_s16 = sphi %s493_s16, %s13_s16   ;;  %s459_s15 = sphi %s491_s15, %s558_s15   ;;  %s455_s14 = sphi %s489_s14, %s557_s14   ;;  %s451_s13 = sphi %s487_s13, %s556_s13   ;;  %s447_s12 = sphi %s485_s12, %s555_s12  }
   0x4   : > { %p23_p0 = scmp.ge.s32.totalorder %s22_s17, 4  ;;  %p357_p1 = scmp.ge.s32.totalorder %s463_s16, 1 }
   0x5   : > { %p158_p2 = scmp.lt.s32.totalorder %s463_s16, 9 }
   0x6   : > { %s560_s17 = smov (%p23_p0, %s22_s17), 0  ;;  %s562_s18 = smov (!%p23_p0, %s25_s18), %s459_s15 }
   0x7   : > { %p159_p3 = pnand %p357_p1, %p158_p2  ;;  %p27_p4 = scmp.ge.s32.totalorder %s562_s18, 2 }
   0x8   : > { %s358_s19 = sshll.u32 (!%p159_p3), %s447_s12, 3  ;;  %p189_p5 = scmp.lt.s32.totalorder (!%p159_p3), %s451_s13, 1 }
   0x9   : > { %s564_s18 = smov (%p27_p4, %s562_s18), 0  ;;  %162 = sbr.rel (%p159_p3) target bundleno = 55 (0x37), region = 32 }
   0xa   : > { %p191_p6 = scmp.lt.s32.totalorder (!%p159_p3), %s358_s19, 31  ;;  %p200_p7 = scmp.lt.s32.totalorder (!%p159_p3), %s447_s12, 3 }
   0xe   : > { %s566_s13 = smov (!%p189_p5, %s451_s13), 1  ;;  %s568_s19 = smov (!%p191_p6, %s358_s19), 31  ;;  %v362_v0 = vld [vmem:[%s552_s1] ss:$0 sm:$0xff] }
   0xf   : > { %s359_s20 = sshll.u32 %s566_s13, 5  ;;  %v363_v12 = vld [vmem:[%s553_s2] ss:$0 sm:$0xff]  ;;  %s570_s12 = smov (!%p200_p7, %s447_s12), 3 }
  0x10   : > { %s194_s21 = sadd.s32 %s359_s20, %s568_s19  ;;  %s361_s30 = sshll.u32 %s566_s13, 2 }
  0x11   : > { %s360_s22 = sshll.u32 %s194_s21, 2  ;;  %s203_s4 = sadd.s32 %s361_s30, %s570_s12 }
  0x12   : > { %s196_s25 = scalar_lea.vmem %s551_s0, %s360_s22  ;;  %s204_s7 = scalar_lea.vmem %s554_s3, %s203_s4 }
  0x13   : > { %v367_v1 = vld [vmem:[%s196_s25] sm:$0xff]   ;;  %v382_v2 = vld [vmem:[%s196_s25 + $0x8] sm:$0xff]   ;;  %v383_v3 = vld [vmem:[%s196_s25 + $0x10] sm:$0xff]  }
  0x14   : > { %v368_v4 = vunpack.c.l.bf16 %v367_v1  ;;  %v369_v5 = vunpack.c.h.bf16 %v367_v1  ;;  %v372_v6 = vunpack.c.l.bf16 %v382_v2  ;;  %v373_v7 = vunpack.c.h.bf16 %v382_v2  ;;  %v384_v8 = vld [vmem:[%s196_s25 + $0x18] sm:$0xff]  }
  0x15   : > { %v376_v9 = vunpack.c.l.bf16 %v383_v3  ;;  %v377_v10 = vunpack.c.h.bf16 %v383_v3  ;;  %v380_v11 = vunpack.c.l.bf16 %v384_v8  ;;  %v381_v17 = vunpack.c.h.bf16 %v384_v8 }
  0x16   : > { %v228_v13 = vmul.f32 %v368_v4, %v362_v0  ;;  %v229_v14 = vmul.f32 %v369_v5, %v362_v0  ;;  %v230_v15 = vmul.f32 %v372_v6, %v362_v0  ;;  %v231_v16 = vmul.f32 %v373_v7, %v362_v0 }
  0x17   : > { %v232_v18 = vmul.f32 %v376_v9, %v362_v0  ;;  %v233_v19 = vmul.f32 %v377_v10, %v362_v0  ;;  %v234_v24 = vmul.f32 %v380_v11, %v362_v0  ;;  %v235_v29 = vmul.f32 %v381_v17, %v362_v0 }
  0x18   : > { %v243_v20 = vadd.f32 %v363_v12, %v228_v13  ;;  %v244_v21 = vadd.f32 %v363_v12, %v229_v14  ;;  %v245_v22 = vadd.f32 %v363_v12, %v230_v15  ;;  %v246_v23 = vadd.f32 %v363_v12, %v231_v16 }
  0x19   : > { %v247_v25 = vadd.f32 %v363_v12, %v232_v18  ;;  %v248_v30 = vadd.f32 %v363_v12, %v233_v19  ;;  %v249_v33 = vadd.f32 %v363_v12, %v234_v24  ;;  %v250_v36 = vadd.f32 %v363_v12, %v235_v29 }
  0x1a   : > { %v251_v26 = vmax.f32 %v243_v20, 0.0  ;;  %v252_v27 = vmax.f32 %v244_v21, 0.0  ;;  %v253_v28 = vmax.f32 %v245_v22, 0.0  ;;  %v254_v31 = vmax.f32 %v246_v23, 0.0 }
  0x1b   : > { %v255_v34 = vmax.f32 %v247_v25, 0.0  ;;  %v256_v37 = vmax.f32 %v248_v30, 0.0  ;;  %v257_v39 = vmax.f32 %v249_v33, 0.0  ;;  %v258_v41 = vmax.f32 %v250_v36, 0.0 }
  0x1c   : > { %v259_v32 = vadd.f32 %v252_v27, %v251_v26 }
  0x1e   : > { %v260_v35 = vadd.f32 %v259_v32, %v253_v28 }
  0x20   : > { %v261_v38 = vadd.f32 %v260_v35, %v254_v31 }
  0x22   : > { %v262_v40 = vadd.f32 %v261_v38, %v255_v34 }
  0x24   : > { %v263_v42 = vadd.f32 %v262_v40, %v256_v37 }
  0x26   : > { %v264_v43 = vadd.f32 %v263_v42, %v257_v39 }
  0x28   : > { %v265_v44 = vadd.f32 %v264_v43, %v258_v41 }
  0x2a   : > { %v266_v45 = vrot.slane %v265_v44, 4 }
  0x2c   : > { %v267_v46 = vadd.f32 %v266_v45, %v265_v44 }
  0x2e   : > { %v268_v47 = vrot.slane %v267_v46, 2 }
  0x30   : > { %v269_v48 = vadd.f32 %v268_v47, %v267_v46 }
  0x32   : > { %v270_v49 = vrot.slane %v269_v48, 1 }
  0x34   : > { %v271_v50 = vadd.f32 %v270_v49, %v269_v48 }
  0x36   : > { %272 = vst [vmem:[%s204_s7] sm:$0x1] %v271_v50 }
  0x37 PF: > { %s13_s16 = sadd.s32 1, %s463_s16   ;;  %s555_s12 = smov %s455_s14 }
  0x38   : > { %p10_p8 = scmp.ge.s32.totalorder %s13_s16, 10   ;;  %s556_s13 = smov %s459_s15 }
  0x39   : > { %s557_s14 = smov %s560_s17  ;;  %s558_s15 = smov %s564_s18 }
  0x3a   :  { %12 = sbr.rel (!%p10_p8) target bundleno = 3 (0x3), region = 62 }

// kernel: basic_conv_block.9
= control target key start
LH: loop header
LB: loop body
LE: loop exit
PB: predicated region body
PF: predicated region fallthrough
CT: control target
= control target key end

     0   :  { %s974_s24 = smov 0   ;;  %s976_s25 = smov 0   ;;  %s1090_s0 = inlined_call_operand.vmem [shape: bf16[2,256,128], index: 0, kind: input, shape index: {}]   ;;  %s1091_s1 = inlined_call_operand.vmem [shape: f32[2,1,128], index: 1, kind: input, shape index: {}]   ;;  %s1092_s2 = inlined_call_operand.vmem [shape: bf16[2,256,128], index: 2, kind: input, shape index: {}]   ;;  %s1093_s3 = inlined_call_operand.vmem [shape: bf16[128,128], index: 3, kind: input, shape index: {}]   ;;  %s1094_s4 = inlined_call_operand.vmem [shape: f32[1,128], index: 4, kind: input, shape index: {}]   ;;  %s1095_s5 = inlined_call_operand.vmem [shape: f32[1,128], index: 5, kind: input, shape index: {}]   ;;  %s1096_s6 = inlined_call_operand.vmem [shape: f32[1,128], index: 6, kind: input, shape index: {}]   ;;  %s1097_s7 = inlined_call_operand.vmem [shape: f32[2,256,128], index: 7, kind: output, shape index: {}]  }
   0x1   :  { %s978_s26 = smov 0   ;;  %s980_s27 = smov 0  }
   0x2   :  { %s982_s28 = smov 0  }
   0x3 LB: > { %s26_s29 = sadd.s32 1, %s924_s26  ;;  %s29_s30 = sadd.s32 1, %s928_s27  ;;  %s932_s28 = sphi %s982_s28, %s17_s28   ;;  %s928_s27 = sphi %s980_s27, %s1101_s27   ;;  %s924_s26 = sphi %s978_s26, %s1100_s26   ;;  %s920_s25 = sphi %s976_s25, %s1099_s25   ;;  %s916_s24 = sphi %s974_s24, %s1098_s24  }
   0x4   : > { %p27_p0 = scmp.ge.s32.totalorder %s26_s29, 4  ;;  %p743_p1 = scmp.ge.s32.totalorder %s932_s28, 1 }
   0x5   : > { %p283_p2 = scmp.lt.s32.totalorder %s932_s28, 9 }
   0x6   : > { %s1103_s29 = smov (%p27_p0, %s26_s29), 0  ;;  %s1105_s30 = smov (!%p27_p0, %s29_s30), %s928_s27 }
   0x7   : > { %p284_p3 = pnand %p743_p1, %p283_p2  ;;  %p31_p4 = scmp.ge.s32.totalorder %s1105_s30, 2 }
   0x8   : > { %s744_s10 = sshll.u32 (!%p284_p3), %s916_s24, 3  ;;  %p336_p5 = scmp.lt.s32.totalorder (!%p284_p3), %s920_s25, 1 }
   0x9   : > { %s1107_s30 = smov (%p31_p4, %s1105_s30), 0  ;;  %287 = sbr.rel (%p284_p3) target bundleno = 251 (0xfb), region = 48 }
   0xa   : > { %p338_p6 = scmp.lt.s32.totalorder (!%p284_p3), %s744_s10, 31 }
   0xe   : > { %v882_v0 = vld [vmem:[%s1093_s3 + $0x38] sm:$0xff]   ;;  %v883_v1 = vld [vmem:[%s1093_s3 + $0x30] sm:$0xff]   ;;  %s1109_s25 = smov (!%p336_p5, %s920_s25), 1  ;;  %v884_v2 = vld [vmem:[%s1093_s3 + $0x28] sm:$0xff]   ;;  %s1111_s10 = smov (!%p338_p6, %s744_s10), 31 }
   0xf   : > { %802 = vmatprep.subr.bf16.mxu0 %v882_v0  ;;  %826 = vmatprep.subr.bf16.mxu1 %v882_v0  ;;  %s745_s15 = sshll.u32 %s1109_s25, 5  ;;  %v885_v3 = vld [vmem:[%s1093_s3 + $0x20] sm:$0xff]   ;;  %v886_v6 = vld [vmem:[%s1093_s3 + $0x18] sm:$0xff]   ;;  %v887_v11 = vld [vmem:[%s1093_s3 + $0x10] sm:$0xff]   ;;  %s347_s20 = scalar_lea.vmem %s1091_s1, %s1109_s25 }
  0x10   : > { %803 = vmatpush3.bf16.msra.mxu0 %v882_v0  ;;  %834 = vmatpush3.bf16.msra.mxu1 %v882_v0  ;;  %s1019_s16 = sadd.s32 %s745_s15, %s1111_s10  ;;  %v753_v8 = vld [vmem:[%s1095_s5] ss:$0 sm:$0xff]  ;;  %v888_v15 = vld [vmem:[%s1093_s3 + $0x8] sm:$0xff]  }
  0x11   : > { %804 = vmatprep.subr.bf16.mxu0 %v883_v1  ;;  %827 = vmatprep.subr.bf16.mxu1 %v883_v1  ;;  %s746_s17 = sshll.u32 %s1019_s16, 2  ;;  %v754_v10 = vld [vmem:[%s1096_s6] ss:$0 sm:$0xff]  ;;  %s752_s9 = sshll.u32 %s1019_s16, 3 }
  0x12   : > { %s1028_s22 = scalar_lea.vmem %s1092_s2, %s746_s17  ;;  %s1035_s8 = scalar_lea.vmem %s1090_s0, %s746_s17  ;;  %v755_v14 = vld [vmem:[%s347_s20] ss:$0 sm:$0xff] }
  0x13   : > { %v890_v4 = vld [vmem:[%s1028_s22] sm:$0xff]   ;;  %v891_v5 = vld [vmem:[%s1028_s22 + $0x10] sm:$0xff]   ;;  %v787_v7 = vld [vmem:[%s1035_s8 + $0x8] sm:$0xff]   ;;  %s366_s12 = scalar_lea.vmem %s1097_s7, %s752_s9 }
  0x14   : > { %805 = vmatpush3.bf16.msra.mxu0 %v883_v1  ;;  %835 = vmatpush3.bf16.msra.mxu1 %v883_v1  ;;  %v777_v9 = vunpack.c.l.bf16 %v787_v7  ;;  %v889_v18 = vld [vmem:[%s1093_s3] sm:$0xff]   ;;  %v892_v19 = vld [vmem:[%s1028_s22 + $0x8] sm:$0xff]   ;;  %v893_v20 = vld [vmem:[%s1028_s22 + $0x18] sm:$0xff]   ;;  %v778_v31 = vunpack.c.h.bf16 %v787_v7 }
  0x15   : > { %806 = vmatprep.subr.bf16.mxu0 %v884_v2  ;;  %828 = vmatprep.subr.bf16.mxu1 %v884_v2  ;;  %v789_v21 = vld [vmem:[%s1035_s8 + $0x18] sm:$0xff]   ;;  %v772_v23 = vld [vmem:[%s1035_s8] sm:$0xff]   ;;  %v788_v24 = vld [vmem:[%s1035_s8 + $0x10] sm:$0xff]  }
  0x16   : > { %818 = vmatprep.mubr.bf16.mxu0 %v890_v4  ;;  %822 = vmatprep.mubr.bf16.mxu1 %v891_v5  ;;  %v394_v12 = vmul.f32 %v777_v9, %v753_v8  ;;  %v785_v22 = vunpack.c.l.bf16 %v789_v21  ;;  %v773_v26 = vunpack.c.l.bf16 %v772_v23  ;;  %v781_v27 = vunpack.c.l.bf16 %v788_v24  ;;  %v756_v59 = vld [vmem:[%s1094_s4] ss:$0 sm:$0xff] }
  0x17   : > { %v786_v32 = vunpack.c.h.bf16 %v789_v21  ;;  %v395_v36 = vmul.f32 %v778_v31, %v753_v8  ;;  %v774_v38 = vunpack.c.h.bf16 %v772_v23  ;;  %v782_v39 = vunpack.c.h.bf16 %v788_v24 }
  0x18   : > { %807 = vmatpush3.bf16.msra.mxu0 %v884_v2  ;;  %836 = vmatpush3.bf16.msra.mxu1 %v884_v2  ;;  %v409_v13 = vadd.f32 %v754_v10, %v394_v12  ;;  %v398_v25 = vmul.f32 %v785_v22, %v753_v8  ;;  %v392_v29 = vmul.f32 %v773_v26, %v753_v8 }
  0x19   : > { %808 = vmatprep.subr.bf16.mxu0 %v885_v3  ;;  %829 = vmatprep.subr.bf16.mxu1 %v885_v3  ;;  %v396_v30 = vmul.f32 %v781_v27, %v753_v8  ;;  %v399_v37 = vmul.f32 %v786_v32, %v753_v8  ;;  %v410_v43 = vadd.f32 %v754_v10, %v395_v36 }
  0x1a   : > { %v417_v16 = vmax.f32 %v409_v13, 0.0  ;;  %v413_v28 = vadd.f32 %v754_v10, %v398_v25  ;;  %v407_v34 = vadd.f32 %v754_v10, %v392_v29  ;;  %v393_v45 = vmul.f32 %v774_v38, %v753_v8 }
  0x1b   : > { %v411_v35 = vadd.f32 %v754_v10, %v396_v30  ;;  %v414_v44 = vadd.f32 %v754_v10, %v399_v37  ;;  %v397_v46 = vmul.f32 %v782_v39, %v753_v8  ;;  %v418_v49 = vmax.f32 %v410_v43, 0.0 }
  0x1c   : > { %809 = vmatpush3.bf16.msra.mxu0 %v885_v3  ;;  %837 = vmatpush3.bf16.msra.mxu1 %v885_v3  ;;  %v1057_v17 = vmul.f32 %v755_v14, %v417_v16  ;;  %v421_v33 = vmax.f32 %v413_v28, 0.0  ;;  %v415_v41 = vmax.f32 %v407_v34, 0.0  ;;  %v408_v51 = vadd.f32 %v754_v10, %v393_v45 }
  0x1d   : > { %810 = vmatprep.subr.bf16.mxu0 %v886_v6  ;;  %830 = vmatprep.subr.bf16.mxu1 %v886_v6  ;;  %v419_v42 = vmax.f32 %v411_v35, 0.0  ;;  %v422_v50 = vmax.f32 %v414_v44, 0.0  ;;  %v412_v52 = vadd.f32 %v754_v10, %v397_v46  ;;  %v433_v53 = vmul.f32 %v755_v14, %v418_v49 }
  0x1e   : > { %v436_v40 = vmul.f32 %v755_v14, %v421_v33  ;;  %v430_v47 = vmul.f32 %v755_v14, %v415_v41  ;;  %v416_v55 = vmax.f32 %v408_v51, 0.0 }
  0x1f   : > { %v434_v48 = vmul.f32 %v755_v14, %v419_v42  ;;  %v437_v54 = vmul.f32 %v755_v14, %v422_v50  ;;  %v420_v56 = vmax.f32 %v412_v52, 0.0 }
  0x20   : > { %811 = vmatpush3.bf16.msra.mxu0 %v886_v6  ;;  %838 = vmatpush3.bf16.msra.mxu1 %v886_v6  ;;  %v431_v57 = vmul.f32 %v755_v14, %v416_v55 }
  0x21   : > { %812 = vmatprep.subr.bf16.mxu0 %v887_v11  ;;  %831 = vmatprep.subr.bf16.mxu1 %v887_v11  ;;  %v435_v58 = vmul.f32 %v755_v14, %v420_v56 }
  0x24   : > { %813 = vmatpush3.bf16.msra.mxu0 %v887_v11  ;;  %839 = vmatpush3.bf16.msra.mxu1 %v887_v11 }
  0x25   : > { %814 = vmatprep.subr.bf16.mxu0 %v888_v15  ;;  %832 = vmatprep.subr.bf16.mxu1 %v888_v15 }
  0x28   : > { %815 = vmatpush3.bf16.msra.mxu0 %v888_v15  ;;  %840 = vmatpush3.bf16.msra.mxu1 %v888_v15 }
  0x29   : > { %816 = vmatprep.subr.bf16.mxu0 %v889_v18  ;;  %833 = vmatprep.subr.bf16.mxu1 %v889_v18 }
  0x2c   : > { %817 = vmatpush3.bf16.msra.mxu0 %v889_v18  ;;  %841 = vmatpush3.bf16.msra.mxu1 %v889_v18 }
  0x2f   : > { %819 = vmatmul.mubr.bf16.vlgmr.msra.gmra.mxu0 %v892_v19  ;;  %823 = vmatmul.mubr.bf16.vlgmr.msra.gmra.mxu1 %v893_v20 }
  0xef   : > { %v820_v60 = vpop.f32.mrf.mxu0  ;;  %v824_v61 = vpop.f32.mrf.mxu1 }
  0xf0   : > { %v584_v62 = vadd.f32 %v820_v60, %v756_v59  ;;  %v600_v63 = vadd.f32 %v824_v61, %v756_v59 }
  0xf1   : > { %v575_v0 = vpop.f32.mrf.mxu0  ;;  %v591_v1 = vpop.f32.mrf.mxu1 }
  0xf2   : > { %v608_v2 = vadd.f32 %v584_v62, %v1057_v17  ;;  %v612_v3 = vadd.f32 %v600_v63, %v436_v40  ;;  %v576_v4 = vadd.f32 %v756_v59, %v575_v0  ;;  %v592_v5 = vadd.f32 %v756_v59, %v591_v1 }
  0xf3   : > { %v821_v6 = vpop.f32.mrf.mxu0  ;;  %v825_v7 = vpop.f32.mrf.mxu1 }
  0xf4   : > { %616 = vst [vmem:[%s366_s12 + $0x10] sm:$0xff] %v608_v2  ;;  %620 = vst [vmem:[%s366_s12 + $0x30] sm:$0xff] %v612_v3  ;;  %v606_v8 = vadd.f32 %v576_v4, %v430_v47  ;;  %v610_v9 = vadd.f32 %v592_v5, %v434_v48  ;;  %v587_v10 = vadd.f32 %v821_v6, %v756_v59 }
  0xf5   : > { %v603_v11 = vadd.f32 %v825_v7, %v756_v59  ;;  %v578_v12 = vpop.f32.mrf.mxu0  ;;  %v594_v13 = vpop.f32.mrf.mxu1 }
  0xf6   : > { %614 = vst [vmem:[%s366_s12] sm:$0xff] %v606_v8  ;;  %618 = vst [vmem:[%s366_s12 + $0x20] sm:$0xff] %v610_v9  ;;  %v609_v14 = vadd.f32 %v587_v10, %v433_v53  ;;  %v579_v16 = vadd.f32 %v756_v59, %v578_v12  ;;  %v595_v18 = vadd.f32 %v756_v59, %v594_v13 }
  0xf7   : > { %v613_v15 = vadd.f32 %v603_v11, %v437_v54 }
  0xf8   : > { %617 = vst [vmem:[%s366_s12 + $0x18] sm:$0xff] %v609_v14  ;;  %v607_v17 = vadd.f32 %v579_v16, %v431_v57  ;;  %v611_v19 = vadd.f32 %v595_v18, %v435_v58 }
  0xf9   : > { %621 = vst [vmem:[%s366_s12 + $0x38] sm:$0xff] %v613_v15 }
  0xfa   : > { %615 = vst [vmem:[%s366_s12 + $0x8] sm:$0xff] %v607_v17  ;;  %619 = vst [vmem:[%s366_s12 + $0x28] sm:$0xff] %v611_v19 }
  0xfb PF: > { %s17_s28 = sadd.s32 1, %s932_s28   ;;  %s1098_s24 = smov %s924_s26 }
  0xfc   : > { %p14_p7 = scmp.ge.s32.totalorder %s17_s28, 10   ;;  %s1099_s25 = smov %s928_s27 }
  0xfd   : > { %s1100_s26 = smov %s1103_s29  ;;  %s1101_s27 = smov %s1107_s30 }
  0xfe   :  { %16 = sbr.rel (!%p14_p7) target bundleno = 3 (0x3), region = 84 }

</bundles_post_ra>
